<compile_context>
chip_gen: v7x
topology: tpu7x:2x2x1
jax: 0.10.0
libtpu: 0.0.40
codegen_flags: <defaults>
</compile_context>

<pallas_src>
import math
import functools

import jax
import jax.numpy as jnp
from jax.experimental import pallas as pl
from jax.experimental.pallas import tpu as pltpu


def _gelu_tanh(x):
    # matches torch.nn.GELU(approximate='tanh')
    c = math.sqrt(2.0 / math.pi)
    return 0.5 * x * (1.0 + jnp.tanh(c * (x + 0.044715 * x * x * x)))


def _layernorm(x, w, b, eps=1e-5):
    mu = jnp.mean(x, axis=-1, keepdims=True)
    var = jnp.mean((x - mu) ** 2, axis=-1, keepdims=True)
    return (x - mu) * jax.lax.rsqrt(var + eps) * w + b


def block_kernel(n_head, tq,
                 x_full_ref, x_tile_ref,
                 ln1w_ref, ln1b_ref,
                 wqkv_ref, bqkv_ref,
                 wproj_ref, bproj_ref,
                 ln2w_ref, ln2b_ref,
                 wfc_ref, bfc_ref,
                 wproj2_ref, bproj2_ref,
                 out_ref,
                 q_s, k_s, v_s):
    f32 = jnp.float32
    bf16 = jnp.bfloat16

    qi = pl.program_id(1)
    T = x_full_ref.shape[1]
    C = x_full_ref.shape[2]
    hd = C // n_head
    n_tiles = T // tq
    scale = 1.0 / math.sqrt(hd)

    # ---------- once per batch element: LN1 + dense QKV projection ----------
    # One lane-dense (T, C) @ (C, 3C) bf16 matmul, then head-major scratch so
    # later tiles never re-slice lanes (paid once per sequence).
    @pl.when(qi == 0)
    def _compute_qkv():
        xf = x_full_ref[0].astype(f32)                              # (T, C)
        h1 = _layernorm(xf, ln1w_ref[0], ln1b_ref[0])
        qkv = jnp.dot(h1.astype(bf16), wqkv_ref[...],
                      preferred_element_type=f32) + bqkv_ref[0]     # (T, 3C)
        for ti in range(n_tiles):
            rows = slice(ti * tq, (ti + 1) * tq)
            for hh in range(n_head):
                c0 = hh * hd
                # pre-scale Q by 1/sqrt(hd) so the score matmul needs no mult
                q_s[ti, hh] = (qkv[rows, c0:c0 + hd] * scale).astype(bf16)
                k_s[ti, hh] = qkv[rows, C + c0:C + c0 + hd].astype(bf16)
                v_s[ti, hh] = qkv[rows, 2 * C + c0:2 * C + c0 + hd].astype(bf16)

    # ---------- flash-style causal attention for this row tile ----------
    q = q_s[qi]                                                     # (H, tq, hd) bf16
    iq = jax.lax.broadcasted_iota(jnp.int32, (tq, tq), 0)
    ik = jax.lax.broadcasted_iota(jnp.int32, (tq, tq), 1)
    diff = iq - ik                                                  # hoisted iotas

    def kv_step(j, carry):
        m, l, acc = carry
        kj = k_s[j]                                                 # (H, tq, hd)
        vj = v_s[j]
        s = jnp.einsum('hqd,hkd->hqk', q, kj,
                       preferred_element_type=f32)                  # (H, tq, tq)
        # global causal mask: (qi*tq + iq) >= (j*tq + ik)
        mask = (diff >= (j - qi) * tq)[None]
        s = jnp.where(mask, s, -jnp.inf)
        m_new = jnp.maximum(m, jnp.max(s, axis=-1, keepdims=True))
        alpha = jnp.exp(m - m_new)
        p = jnp.exp(s - m_new)
        l_new = alpha * l + jnp.sum(p, axis=-1, keepdims=True)
        acc_new = alpha * acc + jnp.einsum('hqk,hkd->hqd', p.astype(bf16), vj,
                                           preferred_element_type=f32)
        return m_new, l_new, acc_new

    m0 = jnp.full((n_head, tq, 1), -jnp.inf, f32)
    l0 = jnp.zeros((n_head, tq, 1), f32)
    a0 = jnp.zeros((n_head, tq, hd), f32)
    # only KV tiles at or below the diagonal: j in [0, qi]
    m, l, acc = jax.lax.fori_loop(0, qi + 1, kv_step, (m0, l0, a0))
    y = acc * pl.reciprocal(l, approx=True)                         # (H, tq, hd)

    # ---------- output projection folded per head (no concat relayout) ----------
    att = jnp.zeros((tq, C), f32)
    for hh in range(n_head):
        att = att + jnp.dot(y[hh].astype(bf16), wproj_ref[hh],
                            preferred_element_type=f32)
    att = att + bproj_ref[0]

    x = x_tile_ref[0].astype(f32) + att                             # residual 1

    # ---------- MLP branch: stream the hidden (4C) dimension ----------
    h2 = _layernorm(x, ln2w_ref[0], ln2b_ref[0]).astype(bf16)       # (tq, C)
    hidden = wfc_ref.shape[1]
    mc = 512 if (hidden % 512 == 0) else hidden
    mlp = jnp.zeros((tq, C), f32)
    for c0 in range(0, hidden, mc):
        hchunk = jnp.dot(h2, wfc_ref[:, c0:c0 + mc],
                         preferred_element_type=f32) + bfc_ref[0, c0:c0 + mc]
        hchunk = _gelu_tanh(hchunk)
        mlp = mlp + jnp.dot(hchunk.astype(bf16), wproj2_ref[c0:c0 + mc, :],
                            preferred_element_type=f32)
    mlp = mlp + bproj2_ref[0]

    # lane-dense (tq, C) store
    out_ref[0] = (x + mlp).astype(out_ref.dtype)


_PARAM_ORDER = ("ln1w", "ln1b", "wqkv", "bqkv", "wproj", "bproj",
                "ln2w", "ln2b", "wfc", "bfc", "wproj2", "bproj2")


def block_forward(x, params, n_head, tq=None):
    B, T, C = x.shape
    assert C % n_head == 0
    hd = C // n_head
    if tq is None:
        tq = 128 if T % 128 == 0 else T
    assert T % tq == 0
    n_tiles = T // tq
    bf16 = jnp.bfloat16

    # Kernel-layout parameters: matmul weights in bf16; attention output
    # projection reshaped head-major (H, hd, C) for the per-head fold.
    kp = {
        "ln1w": params["ln1w"], "ln1b": params["ln1b"],
        "wqkv": params["wqkv"].astype(bf16), "bqkv": params["bqkv"],
        "wproj": params["wproj"].reshape(n_head, hd, C).astype(bf16),
        "bproj": params["bproj"],
        "ln2w": params["ln2w"], "ln2b": params["ln2b"],
        "wfc": params["wfc"].astype(bf16), "bfc": params["bfc"],
        "wproj2": params["wproj2"].astype(bf16), "bproj2": params["bproj2"],
    }
    plist = [kp[k] for k in _PARAM_ORDER]

    def full_spec(p):
        nd = p.ndim
        # constant block index -> fetched once, not re-DMA'd per grid step
        return pl.BlockSpec(p.shape, lambda b, qi, _nd=nd: (0,) * _nd)

    in_specs = (
        [pl.BlockSpec((1, T, C), lambda b, qi: (b, 0, 0)),    # full seq (K/V source)
         pl.BlockSpec((1, tq, C), lambda b, qi: (b, qi, 0))]  # this row tile (residual)
        + [full_spec(p) for p in plist]
    )

    def nbytes(a):
        return a.size * jnp.dtype(a.dtype).itemsize

    flops = 2 * B * T * C * 12 * C + 4 * B * T * T * C
    transcendentals = B * n_head * T * T + 4 * B * T * C
    bytes_accessed = 2 * nbytes(x) + sum(nbytes(p) for p in plist)

    return pl.pallas_call(
        functools.partial(block_kernel, n_head, tq),
        out_shape=jax.ShapeDtypeStruct((B, T, C), x.dtype),
        grid_spec=pltpu.PrefetchScalarGridSpec(
            num_scalar_prefetch=0,
            grid=(B, n_tiles),
            in_specs=in_specs,
            out_specs=pl.BlockSpec((1, tq, C), lambda b, qi: (b, qi, 0)),
            scratch_shapes=[
                pltpu.VMEM((n_tiles, n_head, tq, hd), bf16),   # Q (pre-scaled)
                pltpu.VMEM((n_tiles, n_head, tq, hd), bf16),   # K
                pltpu.VMEM((n_tiles, n_head, tq, hd), bf16),   # V
            ],
        ),
        compiler_params=pltpu.CompilerParams(
            # batch axis parallel (megacore); row-tile axis must stay
            # "arbitrary" because the QKV scratch filled at qi==0 is reused.
            dimension_semantics=("parallel", "arbitrary"),
            vmem_limit_bytes=64 * 1024 * 1024,
        ),
        cost_estimate=pl.CostEstimate(
            flops=flops,
            transcendentals=transcendentals,
            bytes_accessed=bytes_accessed),
    )(x, x, *plist)


# ------------------- pure-JAX reference (for correctness check) -------------------
def block_ref(x, params, n_head):
    B, T, C = x.shape
    hd = C // n_head

    def ln(v, w, b):
        return _layernorm(v, w[0], b[0])

    h = ln(x, params["ln1w"], params["ln1b"])
    qkv = h @ params["wqkv"] + params["bqkv"][0]
    q, k, v = jnp.split(qkv, 3, axis=-1)
    q = q.reshape(B, T, n_head, hd).transpose(0, 2, 1, 3)
    k = k.reshape(B, T, n_head, hd).transpose(0, 2, 1, 3)
    v = v.reshape(B, T, n_head, hd).transpose(0, 2, 1, 3)
    att = jnp.einsum("bhqd,bhkd->bhqk", q, k) / math.sqrt(hd)
    mask = jnp.tril(jnp.ones((T, T), bool))
    att = jnp.where(mask, att, -jnp.inf)
    att = jax.nn.softmax(att, axis=-1)
    y = jnp.einsum("bhqk,bhkd->bhqd", att, v)
    y = y.transpose(0, 2, 1, 3).reshape(B, T, C)
    y = y @ params["wproj"] + params["bproj"][0]
    x = x + y

    h = ln(x, params["ln2w"], params["ln2b"])
    h = _gelu_tanh(h @ params["wfc"] + params["bfc"][0])
    h = h @ params["wproj2"] + params["bproj2"][0]
    return x + h


def init_params(key, n_embed):
    C = n_embed
    ks = jax.random.split(key, 4)
    std = 0.02
    f32 = jnp.float32
    # 1-D params stored as (1, N) so they map cleanly onto VMEM tiles.
    return {
        "ln1w":   jnp.ones((1, C), f32),
        "ln1b":   jnp.zeros((1, C), f32),
        "wqkv":   std * jax.random.normal(ks[0], (C, 3 * C), f32),
        "bqkv":   jnp.zeros((1, 3 * C), f32),
        "wproj":  std * jax.random.normal(ks[1], (C, C), f32),
        "bproj":  jnp.zeros((1, C), f32),
        "ln2w":   jnp.ones((1, C), f32),
        "ln2b":   jnp.zeros((1, C), f32),
        "wfc":    std * jax.random.normal(ks[2], (C, 4 * C), f32),
        "bfc":    jnp.zeros((1, 4 * C), f32),
        "wproj2": std * jax.random.normal(ks[3], (4 * C, C), f32),
        "bproj2": jnp.zeros((1, C), f32),
    }


if __name__ == "__main__":
    B, T, C, n_head = 2, 8, 32, 4   # block_size >= T

    key = jax.random.PRNGKey(0)
    k_x, k_p = jax.random.split(key)
    x = jax.random.normal(k_x, (B, T, C), jnp.float32)
    params = init_params(k_p, C)

    out = block_forward(x, params, n_head)
    out = jax.block_until_ready(out)

    ref = block_ref(x, params, n_head)
    assert out.shape == (B, T, C)
    # bf16 MXU operands (f32 accumulation) -> loosened tolerance vs f32 reference
    assert jnp.allclose(out, ref, atol=2e-2, rtol=2e-2), "mismatch vs reference"

    print("KERNEL_OK")
</pallas_src>

<mosaic_0001>
module attributes {stable_mosaic.version = 11 : i64} {
  func.func @block_kernel(%arg0: i32, %arg1: i32, %arg2: memref<1x8x32xf32, #tpu.memory_space<vmem>>, %arg3: memref<1x8x32xf32, #tpu.memory_space<vmem>>, %arg4: memref<1x32xf32, #tpu.memory_space<vmem>>, %arg5: memref<1x32xf32, #tpu.memory_space<vmem>>, %arg6: memref<32x96xbf16, #tpu.memory_space<vmem>>, %arg7: memref<1x96xf32, #tpu.memory_space<vmem>>, %arg8: memref<4x8x32xbf16, #tpu.memory_space<vmem>>, %arg9: memref<1x32xf32, #tpu.memory_space<vmem>>, %arg10: memref<1x32xf32, #tpu.memory_space<vmem>>, %arg11: memref<1x32xf32, #tpu.memory_space<vmem>>, %arg12: memref<32x128xbf16, #tpu.memory_space<vmem>>, %arg13: memref<1x128xf32, #tpu.memory_space<vmem>>, %arg14: memref<128x32xbf16, #tpu.memory_space<vmem>>, %arg15: memref<1x32xf32, #tpu.memory_space<vmem>>, %arg16: memref<1x8x32xf32, #tpu.memory_space<vmem>>, %arg17: memref<1x4x8x8xbf16, #tpu.memory_space<vmem>>, %arg18: memref<1x4x8x8xbf16, #tpu.memory_space<vmem>>, %arg19: memref<1x4x8x8xbf16, #tpu.memory_space<vmem>>) attributes {dimension_semantics = [#tpu.dimension_semantics<parallel>, #tpu.dimension_semantics<arbitrary>], iteration_bounds = array<i64: 2, 1>, scalar_prefetch = 0 : i64, scratch_operands = 3 : i64, tpu.core_type = #tpu.core_type<tc>, window_params = [{transform_indices = @transform_0, window_bounds = array<i64: 1, 8, 32>}, {transform_indices = @transform_1, window_bounds = array<i64: 1, 8, 32>}, {pipeline_mode = #tpu.pipeline_mode<synchronous>, transform_indices = @transform_2, window_bounds = array<i64: 1, 32>}, {pipeline_mode = #tpu.pipeline_mode<synchronous>, transform_indices = @transform_3, window_bounds = array<i64: 1, 32>}, {pipeline_mode = #tpu.pipeline_mode<synchronous>, transform_indices = @transform_4, window_bounds = array<i64: 32, 96>}, {pipeline_mode = #tpu.pipeline_mode<synchronous>, transform_indices = @transform_5, window_bounds = array<i64: 1, 96>}, {pipeline_mode = #tpu.pipeline_mode<synchronous>, transform_indices = @transform_6, window_bounds = array<i64: 4, 8, 32>}, {pipeline_mode = #tpu.pipeline_mode<synchronous>, transform_indices = @transform_7, window_bounds = array<i64: 1, 32>}, {pipeline_mode = #tpu.pipeline_mode<synchronous>, transform_indices = @transform_8, window_bounds = array<i64: 1, 32>}, {pipeline_mode = #tpu.pipeline_mode<synchronous>, transform_indices = @transform_9, window_bounds = array<i64: 1, 32>}, {pipeline_mode = #tpu.pipeline_mode<synchronous>, transform_indices = @transform_10, window_bounds = array<i64: 32, 128>}, {pipeline_mode = #tpu.pipeline_mode<synchronous>, transform_indices = @transform_11, window_bounds = array<i64: 1, 128>}, {pipeline_mode = #tpu.pipeline_mode<synchronous>, transform_indices = @transform_12, window_bounds = array<i64: 128, 32>}, {pipeline_mode = #tpu.pipeline_mode<synchronous>, transform_indices = @transform_13, window_bounds = array<i64: 1, 32>}, {transform_indices = @transform_14, window_bounds = array<i64: 1, 8, 32>}]} {
    %c0_i32 = arith.constant 0 : i32
    %0 = arith.cmpi eq, %arg1, %c0_i32 : i32
    %1 = arith.extui %0 : i1 to i32
    %c0_i32_0 = arith.constant 0 : i32
    %2 = arith.cmpi ne, %1, %c0_i32_0 : i32
    scf.if %2 {
      %c0_53 = arith.constant 0 : index
      %c0_54 = arith.constant 0 : index
      %c0_55 = arith.constant 0 : index
      %119 = vector.load %arg2[%c0_53, %c0_54, %c0_55] : memref<1x8x32xf32, #tpu.memory_space<vmem>>, vector<1x8x32xf32>
      %120 = vector.shape_cast %119 : vector<1x8x32xf32> to vector<8x32xf32>
      %c0_56 = arith.constant 0 : index
      %c0_57 = arith.constant 0 : index
      %121 = vector.load %arg4[%c0_56, %c0_57] : memref<1x32xf32, #tpu.memory_space<vmem>>, vector<1x32xf32>
      %122 = vector.shape_cast %121 : vector<1x32xf32> to vector<32xf32>
      %c0_58 = arith.constant 0 : index
      %c0_59 = arith.constant 0 : index
      %123 = vector.load %arg5[%c0_58, %c0_59] : memref<1x32xf32, #tpu.memory_space<vmem>>, vector<1x32xf32>
      %124 = vector.shape_cast %123 : vector<1x32xf32> to vector<32xf32>
      %cst_60 = arith.constant dense<0.000000e+00> : vector<8xf32>
      %125 = vector.multi_reduction <add>, %120, %cst_60 [1] : vector<8x32xf32> to vector<8xf32>
      %126 = vector.shape_cast %125 : vector<8xf32> to vector<8x1xf32>
      %cst_61 = arith.constant 3.200000e+01 : f32
      %127 = vector.broadcast %cst_61 : f32 to vector<8x1xf32>
      %128 = arith.divf %126, %127 : vector<8x1xf32>
      %129 = vector.broadcast %128 : vector<8x1xf32> to vector<8x32xf32>
      %130 = arith.subf %120, %129 : vector<8x32xf32>
      %131 = arith.mulf %130, %130 : vector<8x32xf32>
      %cst_62 = arith.constant dense<0.000000e+00> : vector<8xf32>
      %132 = vector.multi_reduction <add>, %131, %cst_62 [1] : vector<8x32xf32> to vector<8xf32>
      %133 = vector.shape_cast %132 : vector<8xf32> to vector<8x1xf32>
      %cst_63 = arith.constant 3.200000e+01 : f32
      %134 = vector.broadcast %cst_63 : f32 to vector<8x1xf32>
      %135 = arith.divf %133, %134 : vector<8x1xf32>
      %136 = vector.broadcast %128 : vector<8x1xf32> to vector<8x32xf32>
      %137 = arith.subf %120, %136 : vector<8x32xf32>
      %cst_64 = arith.constant 9.99999974E-6 : f32
      %138 = vector.broadcast %cst_64 : f32 to vector<8x1xf32>
      %139 = arith.addf %135, %138 : vector<8x1xf32>
      %140 = math.rsqrt %139 : vector<8x1xf32>
      %141 = vector.broadcast %140 : vector<8x1xf32> to vector<8x32xf32>
      %142 = arith.mulf %137, %141 : vector<8x32xf32>
      %143 = vector.shape_cast %122 : vector<32xf32> to vector<1x32xf32>
      %144 = vector.broadcast %143 : vector<1x32xf32> to vector<8x32xf32>
      %145 = arith.mulf %142, %144 : vector<8x32xf32>
      %146 = vector.shape_cast %124 : vector<32xf32> to vector<1x32xf32>
      %147 = vector.broadcast %146 : vector<1x32xf32> to vector<8x32xf32>
      %148 = arith.addf %145, %147 : vector<8x32xf32>
      %149 = arith.truncf %148 : vector<8x32xf32> to vector<8x32xbf16>
      %c0_65 = arith.constant 0 : index
      %c0_66 = arith.constant 0 : index
      %150 = vector.load %arg6[%c0_65, %c0_66] : memref<32x96xbf16, #tpu.memory_space<vmem>>, vector<32x96xbf16>
      %cst_67 = arith.constant dense<0.000000e+00> : vector<8x96xf32>
      %151 = tpu.matmul %149, %150, %cst_67 {dimension_numbers = #tpu.dot_dimension_numbers<[1], [0], [0], [1], [0, 0, 1, 1], [], []>} : vector<8x32xbf16>, vector<32x96xbf16>, vector<8x96xf32> -> vector<8x96xf32>
      %c0_68 = arith.constant 0 : index
      %c0_69 = arith.constant 0 : index
      %152 = vector.load %arg7[%c0_68, %c0_69] : memref<1x96xf32, #tpu.memory_space<vmem>>, vector<1x96xf32>
      %153 = vector.shape_cast %152 : vector<1x96xf32> to vector<96xf32>
      %154 = vector.shape_cast %153 : vector<96xf32> to vector<1x96xf32>
      %155 = vector.broadcast %154 : vector<1x96xf32> to vector<8x96xf32>
      %156 = arith.addf %151, %155 : vector<8x96xf32>
      %157 = vector.extract_strided_slice %156 {offsets = [0, 0], sizes = [8, 8], strides = [1, 1]} : vector<8x96xf32> to vector<8x8xf32>
      %cst_70 = arith.constant 0.353553385 : f32
      %158 = vector.broadcast %cst_70 : f32 to vector<8x8xf32>
      %159 = arith.mulf %157, %158 : vector<8x8xf32>
      %160 = arith.truncf %159 : vector<8x8xf32> to vector<8x8xbf16>
      %c0_71 = arith.constant 0 : index
      %c0_72 = arith.constant 0 : index
      %c0_73 = arith.constant 0 : index
      %c0_74 = arith.constant 0 : index
      %161 = vector.load %arg17[%c0_71, %c0_72, %c0_73, %c0_74] : memref<1x4x8x8xbf16, #tpu.memory_space<vmem>>, vector<1x1x8x8xbf16>
      %162 = vector.shape_cast %161 : vector<1x1x8x8xbf16> to vector<8x8xbf16>
      %163 = vector.shape_cast %160 : vector<8x8xbf16> to vector<1x1x8x8xbf16>
      tpu.vector_store %arg17[%c0_71, %c0_72, %c0_73, %c0_74], %163 {strides = array<i32>} : memref<1x4x8x8xbf16, #tpu.memory_space<vmem>>, vector<1x1x8x8xbf16>,
      %164 = vector.extract_strided_slice %156 {offsets = [0, 32], sizes = [8, 8], strides = [1, 1]} : vector<8x96xf32> to vector<8x8xf32>
      %165 = arith.truncf %164 : vector<8x8xf32> to vector<8x8xbf16>
      %c0_75 = arith.constant 0 : index
      %c0_76 = arith.constant 0 : index
      %c0_77 = arith.constant 0 : index
      %c0_78 = arith.constant 0 : index
      %166 = vector.load %arg18[%c0_75, %c0_76, %c0_77, %c0_78] : memref<1x4x8x8xbf16, #tpu.memory_space<vmem>>, vector<1x1x8x8xbf16>
      %167 = vector.shape_cast %166 : vector<1x1x8x8xbf16> to vector<8x8xbf16>
      %168 = vector.shape_cast %165 : vector<8x8xbf16> to vector<1x1x8x8xbf16>
      tpu.vector_store %arg18[%c0_75, %c0_76, %c0_77, %c0_78], %168 {strides = array<i32>} : memref<1x4x8x8xbf16, #tpu.memory_space<vmem>>, vector<1x1x8x8xbf16>,
      %169 = vector.extract_strided_slice %156 {offsets = [0, 64], sizes = [8, 8], strides = [1, 1]} : vector<8x96xf32> to vector<8x8xf32>
      %170 = arith.truncf %169 : vector<8x8xf32> to vector<8x8xbf16>
      %c0_79 = arith.constant 0 : index
      %c0_80 = arith.constant 0 : index
      %c0_81 = arith.constant 0 : index
      %c0_82 = arith.constant 0 : index
      %171 = vector.load %arg19[%c0_79, %c0_80, %c0_81, %c0_82] : memref<1x4x8x8xbf16, #tpu.memory_space<vmem>>, vector<1x1x8x8xbf16>
      %172 = vector.shape_cast %171 : vector<1x1x8x8xbf16> to vector<8x8xbf16>
      %173 = vector.shape_cast %170 : vector<8x8xbf16> to vector<1x1x8x8xbf16>
      tpu.vector_store %arg19[%c0_79, %c0_80, %c0_81, %c0_82], %173 {strides = array<i32>} : memref<1x4x8x8xbf16, #tpu.memory_space<vmem>>, vector<1x1x8x8xbf16>,
      %174 = vector.extract_strided_slice %156 {offsets = [0, 8], sizes = [8, 8], strides = [1, 1]} : vector<8x96xf32> to vector<8x8xf32>
      %cst_83 = arith.constant 0.353553385 : f32
      %175 = vector.broadcast %cst_83 : f32 to vector<8x8xf32>
      %176 = arith.mulf %174, %175 : vector<8x8xf32>
      %177 = arith.truncf %176 : vector<8x8xf32> to vector<8x8xbf16>
      %c0_84 = arith.constant 0 : index
      %c1_85 = arith.constant 1 : index
      %c0_86 = arith.constant 0 : index
      %c0_87 = arith.constant 0 : index
      %178 = vector.load %arg17[%c0_84, %c1_85, %c0_86, %c0_87] : memref<1x4x8x8xbf16, #tpu.memory_space<vmem>>, vector<1x1x8x8xbf16>
      %179 = vector.shape_cast %178 : vector<1x1x8x8xbf16> to vector<8x8xbf16>
      %180 = vector.shape_cast %177 : vector<8x8xbf16> to vector<1x1x8x8xbf16>
      tpu.vector_store %arg17[%c0_84, %c1_85, %c0_86, %c0_87], %180 {strides = array<i32>} : memref<1x4x8x8xbf16, #tpu.memory_space<vmem>>, vector<1x1x8x8xbf16>,
      %181 = vector.extract_strided_slice %156 {offsets = [0, 40], sizes = [8, 8], strides = [1, 1]} : vector<8x96xf32> to vector<8x8xf32>
      %182 = arith.truncf %181 : vector<8x8xf32> to vector<8x8xbf16>
      %c0_88 = arith.constant 0 : index
      %c1_89 = arith.constant 1 : index
      %c0_90 = arith.constant 0 : index
      %c0_91 = arith.constant 0 : index
      %183 = vector.load %arg18[%c0_88, %c1_89, %c0_90, %c0_91] : memref<1x4x8x8xbf16, #tpu.memory_space<vmem>>, vector<1x1x8x8xbf16>
      %184 = vector.shape_cast %183 : vector<1x1x8x8xbf16> to vector<8x8xbf16>
      %185 = vector.shape_cast %182 : vector<8x8xbf16> to vector<1x1x8x8xbf16>
      tpu.vector_store %arg18[%c0_88, %c1_89, %c0_90, %c0_91], %185 {strides = array<i32>} : memref<1x4x8x8xbf16, #tpu.memory_space<vmem>>, vector<1x1x8x8xbf16>,
      %186 = vector.extract_strided_slice %156 {offsets = [0, 72], sizes = [8, 8], strides = [1, 1]} : vector<8x96xf32> to vector<8x8xf32>
      %187 = arith.truncf %186 : vector<8x8xf32> to vector<8x8xbf16>
      %c0_92 = arith.constant 0 : index
      %c1_93 = arith.constant 1 : index
      %c0_94 = arith.constant 0 : index
      %c0_95 = arith.constant 0 : index
      %188 = vector.load %arg19[%c0_92, %c1_93, %c0_94, %c0_95] : memref<1x4x8x8xbf16, #tpu.memory_space<vmem>>, vector<1x1x8x8xbf16>
      %189 = vector.shape_cast %188 : vector<1x1x8x8xbf16> to vector<8x8xbf16>
      %190 = vector.shape_cast %187 : vector<8x8xbf16> to vector<1x1x8x8xbf16>
      tpu.vector_store %arg19[%c0_92, %c1_93, %c0_94, %c0_95], %190 {strides = array<i32>} : memref<1x4x8x8xbf16, #tpu.memory_space<vmem>>, vector<1x1x8x8xbf16>,
      %191 = vector.extract_strided_slice %156 {offsets = [0, 16], sizes = [8, 8], strides = [1, 1]} : vector<8x96xf32> to vector<8x8xf32>
      %cst_96 = arith.constant 0.353553385 : f32
      %192 = vector.broadcast %cst_96 : f32 to vector<8x8xf32>
      %193 = arith.mulf %191, %192 : vector<8x8xf32>
      %194 = arith.truncf %193 : vector<8x8xf32> to vector<8x8xbf16>
      %c0_97 = arith.constant 0 : index
      %c2_98 = arith.constant 2 : index
      %c0_99 = arith.constant 0 : index
      %c0_100 = arith.constant 0 : index
      %195 = vector.load %arg17[%c0_97, %c2_98, %c0_99, %c0_100] : memref<1x4x8x8xbf16, #tpu.memory_space<vmem>>, vector<1x1x8x8xbf16>
      %196 = vector.shape_cast %195 : vector<1x1x8x8xbf16> to vector<8x8xbf16>
      %197 = vector.shape_cast %194 : vector<8x8xbf16> to vector<1x1x8x8xbf16>
      tpu.vector_store %arg17[%c0_97, %c2_98, %c0_99, %c0_100], %197 {strides = array<i32>} : memref<1x4x8x8xbf16, #tpu.memory_space<vmem>>, vector<1x1x8x8xbf16>,
      %198 = vector.extract_strided_slice %156 {offsets = [0, 48], sizes = [8, 8], strides = [1, 1]} : vector<8x96xf32> to vector<8x8xf32>
      %199 = arith.truncf %198 : vector<8x8xf32> to vector<8x8xbf16>
      %c0_101 = arith.constant 0 : index
      %c2_102 = arith.constant 2 : index
      %c0_103 = arith.constant 0 : index
      %c0_104 = arith.constant 0 : index
      %200 = vector.load %arg18[%c0_101, %c2_102, %c0_103, %c0_104] : memref<1x4x8x8xbf16, #tpu.memory_space<vmem>>, vector<1x1x8x8xbf16>
      %201 = vector.shape_cast %200 : vector<1x1x8x8xbf16> to vector<8x8xbf16>
      %202 = vector.shape_cast %199 : vector<8x8xbf16> to vector<1x1x8x8xbf16>
      tpu.vector_store %arg18[%c0_101, %c2_102, %c0_103, %c0_104], %202 {strides = array<i32>} : memref<1x4x8x8xbf16, #tpu.memory_space<vmem>>, vector<1x1x8x8xbf16>,
      %203 = vector.extract_strided_slice %156 {offsets = [0, 80], sizes = [8, 8], strides = [1, 1]} : vector<8x96xf32> to vector<8x8xf32>
      %204 = arith.truncf %203 : vector<8x8xf32> to vector<8x8xbf16>
      %c0_105 = arith.constant 0 : index
      %c2_106 = arith.constant 2 : index
      %c0_107 = arith.constant 0 : index
      %c0_108 = arith.constant 0 : index
      %205 = vector.load %arg19[%c0_105, %c2_106, %c0_107, %c0_108] : memref<1x4x8x8xbf16, #tpu.memory_space<vmem>>, vector<1x1x8x8xbf16>
      %206 = vector.shape_cast %205 : vector<1x1x8x8xbf16> to vector<8x8xbf16>
      %207 = vector.shape_cast %204 : vector<8x8xbf16> to vector<1x1x8x8xbf16>
      tpu.vector_store %arg19[%c0_105, %c2_106, %c0_107, %c0_108], %207 {strides = array<i32>} : memref<1x4x8x8xbf16, #tpu.memory_space<vmem>>, vector<1x1x8x8xbf16>,
      %208 = vector.extract_strided_slice %156 {offsets = [0, 24], sizes = [8, 8], strides = [1, 1]} : vector<8x96xf32> to vector<8x8xf32>
      %cst_109 = arith.constant 0.353553385 : f32
      %209 = vector.broadcast %cst_109 : f32 to vector<8x8xf32>
      %210 = arith.mulf %208, %209 : vector<8x8xf32>
      %211 = arith.truncf %210 : vector<8x8xf32> to vector<8x8xbf16>
      %c0_110 = arith.constant 0 : index
      %c3_111 = arith.constant 3 : index
      %c0_112 = arith.constant 0 : index
      %c0_113 = arith.constant 0 : index
      %212 = vector.load %arg17[%c0_110, %c3_111, %c0_112, %c0_113] : memref<1x4x8x8xbf16, #tpu.memory_space<vmem>>, vector<1x1x8x8xbf16>
      %213 = vector.shape_cast %212 : vector<1x1x8x8xbf16> to vector<8x8xbf16>
      %214 = vector.shape_cast %211 : vector<8x8xbf16> to vector<1x1x8x8xbf16>
      tpu.vector_store %arg17[%c0_110, %c3_111, %c0_112, %c0_113], %214 {strides = array<i32>} : memref<1x4x8x8xbf16, #tpu.memory_space<vmem>>, vector<1x1x8x8xbf16>,
      %215 = vector.extract_strided_slice %156 {offsets = [0, 56], sizes = [8, 8], strides = [1, 1]} : vector<8x96xf32> to vector<8x8xf32>
      %216 = arith.truncf %215 : vector<8x8xf32> to vector<8x8xbf16>
      %c0_114 = arith.constant 0 : index
      %c3_115 = arith.constant 3 : index
      %c0_116 = arith.constant 0 : index
      %c0_117 = arith.constant 0 : index
      %217 = vector.load %arg18[%c0_114, %c3_115, %c0_116, %c0_117] : memref<1x4x8x8xbf16, #tpu.memory_space<vmem>>, vector<1x1x8x8xbf16>
      %218 = vector.shape_cast %217 : vector<1x1x8x8xbf16> to vector<8x8xbf16>
      %219 = vector.shape_cast %216 : vector<8x8xbf16> to vector<1x1x8x8xbf16>
      tpu.vector_store %arg18[%c0_114, %c3_115, %c0_116, %c0_117], %219 {strides = array<i32>} : memref<1x4x8x8xbf16, #tpu.memory_space<vmem>>, vector<1x1x8x8xbf16>,
      %220 = vector.extract_strided_slice %156 {offsets = [0, 88], sizes = [8, 8], strides = [1, 1]} : vector<8x96xf32> to vector<8x8xf32>
      %221 = arith.truncf %220 : vector<8x8xf32> to vector<8x8xbf16>
      %c0_118 = arith.constant 0 : index
      %c3_119 = arith.constant 3 : index
      %c0_120 = arith.constant 0 : index
      %c0_121 = arith.constant 0 : index
      %222 = vector.load %arg19[%c0_118, %c3_119, %c0_120, %c0_121] : memref<1x4x8x8xbf16, #tpu.memory_space<vmem>>, vector<1x1x8x8xbf16>
      %223 = vector.shape_cast %222 : vector<1x1x8x8xbf16> to vector<8x8xbf16>
      %224 = vector.shape_cast %221 : vector<8x8xbf16> to vector<1x1x8x8xbf16>
      tpu.vector_store %arg19[%c0_118, %c3_119, %c0_120, %c0_121], %224 {strides = array<i32>} : memref<1x4x8x8xbf16, #tpu.memory_space<vmem>>, vector<1x1x8x8xbf16>,
    } else {
    }
    %3 = arith.index_cast %arg1 : i32 to index
    %c0 = arith.constant 0 : index
    %c0_1 = arith.constant 0 : index
    %c0_2 = arith.constant 0 : index
    %4 = vector.load %arg17[%3, %c0, %c0_1, %c0_2] : memref<1x4x8x8xbf16, #tpu.memory_space<vmem>>, vector<1x4x8x8xbf16>
    %5 = vector.shape_cast %4 : vector<1x4x8x8xbf16> to vector<4x8x8xbf16>
    %6 = tpu.iota {dimensions = array<i32: 0>} : vector<8x8xi32>
    %7 = tpu.iota {dimensions = array<i32: 1>} : vector<8x8xi32>
    %8 = arith.subi %6, %7 : vector<8x8xi32>
    %cst = arith.constant 0xFF800000 : f32
    %9 = vector.broadcast %cst : f32 to vector<4x8x1xf32>
    %cst_3 = arith.constant 0.000000e+00 : f32
    %10 = vector.broadcast %cst_3 : f32 to vector<4x8x1xf32>
    %cst_4 = arith.constant 0.000000e+00 : f32
    %11 = vector.broadcast %cst_4 : f32 to vector<4x8x8xf32>
    %c1_i32 = arith.constant 1 : i32
    %12 = arith.addi %arg1, %c1_i32 : i32
    %c0_i32_5 = arith.constant 0 : i32
    %13 = arith.subi %12, %c0_i32_5 : i32
    %14 = arith.addi %c0_i32_5, %13 : i32
    %c1_i32_6 = arith.constant 1 : i32
    %15:3 = scf.for %arg20 = %c0_i32_5 to %14 step %c1_i32_6 iter_args(%arg21 = %9, %arg22 = %10, %arg23 = %11) -> (vector<4x8x1xf32>, vector<4x8x1xf32>, vector<4x8x8xf32>)  : i32 {
      %119 = arith.index_cast %arg20 : i32 to index
      %c0_53 = arith.constant 0 : index
      %c0_54 = arith.constant 0 : index
      %c0_55 = arith.constant 0 : index
      %120 = vector.load %arg18[%119, %c0_53, %c0_54, %c0_55] : memref<1x4x8x8xbf16, #tpu.memory_space<vmem>>, vector<1x4x8x8xbf16>
      %121 = vector.shape_cast %120 : vector<1x4x8x8xbf16> to vector<4x8x8xbf16>
      %122 = arith.index_cast %arg20 : i32 to index
      %c0_56 = arith.constant 0 : index
      %c0_57 = arith.constant 0 : index
      %c0_58 = arith.constant 0 : index
      %123 = vector.load %arg19[%122, %c0_56, %c0_57, %c0_58] : memref<1x4x8x8xbf16, #tpu.memory_space<vmem>>, vector<1x4x8x8xbf16>
      %124 = vector.shape_cast %123 : vector<1x4x8x8xbf16> to vector<4x8x8xbf16>
      "tpu.trace_start"() <{level = 10 : i32, message = "hqd,hkd->hqk"}> : () -> ()
      %cst_59 = arith.constant dense<0.000000e+00> : vector<4x8x8xf32>
      %125 = tpu.matmul %5, %121, %cst_59 {dimension_numbers = #tpu.dot_dimension_numbers<[2], [2], [1], [1], [0, 0, 0, 1, 1, 1], [0], [0]>} : vector<4x8x8xbf16>, vector<4x8x8xbf16>, vector<4x8x8xf32> -> vector<4x8x8xf32>
      "tpu.trace_stop"() : () -> ()
      %126 = arith.subi %arg20, %arg1 : i32
      %c8_i32 = arith.constant 8 : i32
      %127 = arith.muli %126, %c8_i32 : i32
      %128 = vector.broadcast %127 : i32 to vector<8x8xi32>
      %129 = arith.cmpi sge, %8, %128 : vector<8x8xi32>
      %130 = vector.shape_cast %129 : vector<8x8xi1> to vector<1x8x8xi1>
      %cst_60 = arith.constant 0xFF800000 : f32
      %131 = vector.shape_cast %130 : vector<1x8x8xi1> to vector<1x8x8xi1>
      %132 = vector.broadcast %131 : vector<1x8x8xi1> to vector<4x8x8xi1>
      %133 = vector.broadcast %cst_60 : f32 to vector<4x8x8xf32>
      %134 = arith.select %132, %125, %133 : vector<4x8x8xi1>, vector<4x8x8xf32>
      %cst_61 = arith.constant dense<0xFF800000> : vector<4x8xf32>
      %135 = vector.multi_reduction <maximumf>, %134, %cst_61 [2] : vector<4x8x8xf32> to vector<4x8xf32>
      %136 = vector.shape_cast %135 : vector<4x8xf32> to vector<4x8x1xf32>
      %137 = arith.maximumf %arg21, %136 : vector<4x8x1xf32>
      %138 = arith.subf %arg21, %137 : vector<4x8x1xf32>
      %139 = math.exp %138 : vector<4x8x1xf32>
      %140 = vector.broadcast %137 : vector<4x8x1xf32> to vector<4x8x8xf32>
      %141 = arith.subf %134, %140 : vector<4x8x8xf32>
      %142 = math.exp %141 : vector<4x8x8xf32>
      %143 = arith.mulf %139, %arg22 : vector<4x8x1xf32>
      %cst_62 = arith.constant dense<0.000000e+00> : vector<4x8xf32>
      %144 = vector.multi_reduction <add>, %142, %cst_62 [2] : vector<4x8x8xf32> to vector<4x8xf32>
      %145 = vector.shape_cast %144 : vector<4x8xf32> to vector<4x8x1xf32>
      %146 = arith.addf %143, %145 : vector<4x8x1xf32>
      %147 = vector.broadcast %139 : vector<4x8x1xf32> to vector<4x8x8xf32>
      %148 = arith.mulf %147, %arg23 : vector<4x8x8xf32>
      %149 = arith.truncf %142 : vector<4x8x8xf32> to vector<4x8x8xbf16>
      "tpu.trace_start"() <{level = 10 : i32, message = "hqk,hkd->hqd"}> : () -> ()
      %cst_63 = arith.constant dense<0.000000e+00> : vector<4x8x8xf32>
      %150 = tpu.matmul %149, %124, %cst_63 {dimension_numbers = #tpu.dot_dimension_numbers<[2], [1], [1], [2], [0, 0, 0, 1, 1, 2], [0], [0]>} : vector<4x8x8xbf16>, vector<4x8x8xbf16>, vector<4x8x8xf32> -> vector<4x8x8xf32>
      "tpu.trace_stop"() : () -> ()
      %151 = arith.addf %148, %150 : vector<4x8x8xf32>
      scf.yield %137, %146, %151 : vector<4x8x1xf32>, vector<4x8x1xf32>, vector<4x8x8xf32>
    }
    %16 = tpu.reciprocal %15#1 {approx = true} : vector<4x8x1xf32> -> vector<4x8x1xf32>
    %17 = vector.broadcast %16 : vector<4x8x1xf32> to vector<4x8x8xf32>
    %18 = arith.mulf %15#2, %17 : vector<4x8x8xf32>
    %cst_7 = arith.constant 0.000000e+00 : f32
    %19 = vector.broadcast %cst_7 : f32 to vector<8x32xf32>
    %20 = vector.extract_strided_slice %18 {offsets = [0, 0, 0], sizes = [1, 8, 8], strides = [1, 1, 1]} : vector<4x8x8xf32> to vector<1x8x8xf32>
    %21 = vector.shape_cast %20 : vector<1x8x8xf32> to vector<8x8xf32>
    %22 = arith.truncf %21 : vector<8x8xf32> to vector<8x8xbf16>
    %c0_8 = arith.constant 0 : index
    %c0_9 = arith.constant 0 : index
    %c0_10 = arith.constant 0 : index
    %23 = vector.load %arg8[%c0_8, %c0_9, %c0_10] : memref<4x8x32xbf16, #tpu.memory_space<vmem>>, vector<1x8x32xbf16>
    %24 = vector.shape_cast %23 : vector<1x8x32xbf16> to vector<8x32xbf16>
    %cst_11 = arith.constant dense<0.000000e+00> : vector<8x32xf32>
    %25 = tpu.matmul %22, %24, %cst_11 {dimension_numbers = #tpu.dot_dimension_numbers<[1], [0], [0], [1], [0, 0, 1, 1], [], []>} : vector<8x8xbf16>, vector<8x32xbf16>, vector<8x32xf32> -> vector<8x32xf32>
    %26 = arith.addf %19, %25 : vector<8x32xf32>
    %27 = vector.extract_strided_slice %18 {offsets = [1, 0, 0], sizes = [1, 8, 8], strides = [1, 1, 1]} : vector<4x8x8xf32> to vector<1x8x8xf32>
    %28 = vector.shape_cast %27 : vector<1x8x8xf32> to vector<8x8xf32>
    %29 = arith.truncf %28 : vector<8x8xf32> to vector<8x8xbf16>
    %c1 = arith.constant 1 : index
    %c0_12 = arith.constant 0 : index
    %c0_13 = arith.constant 0 : index
    %30 = vector.load %arg8[%c1, %c0_12, %c0_13] : memref<4x8x32xbf16, #tpu.memory_space<vmem>>, vector<1x8x32xbf16>
    %31 = vector.shape_cast %30 : vector<1x8x32xbf16> to vector<8x32xbf16>
    %cst_14 = arith.constant dense<0.000000e+00> : vector<8x32xf32>
    %32 = tpu.matmul %29, %31, %cst_14 {dimension_numbers = #tpu.dot_dimension_numbers<[1], [0], [0], [1], [0, 0, 1, 1], [], []>} : vector<8x8xbf16>, vector<8x32xbf16>, vector<8x32xf32> -> vector<8x32xf32>
    %33 = arith.addf %26, %32 : vector<8x32xf32>
    %34 = vector.extract_strided_slice %18 {offsets = [2, 0, 0], sizes = [1, 8, 8], strides = [1, 1, 1]} : vector<4x8x8xf32> to vector<1x8x8xf32>
    %35 = vector.shape_cast %34 : vector<1x8x8xf32> to vector<8x8xf32>
    %36 = arith.truncf %35 : vector<8x8xf32> to vector<8x8xbf16>
    %c2 = arith.constant 2 : index
    %c0_15 = arith.constant 0 : index
    %c0_16 = arith.constant 0 : index
    %37 = vector.load %arg8[%c2, %c0_15, %c0_16] : memref<4x8x32xbf16, #tpu.memory_space<vmem>>, vector<1x8x32xbf16>
    %38 = vector.shape_cast %37 : vector<1x8x32xbf16> to vector<8x32xbf16>
    %cst_17 = arith.constant dense<0.000000e+00> : vector<8x32xf32>
    %39 = tpu.matmul %36, %38, %cst_17 {dimension_numbers = #tpu.dot_dimension_numbers<[1], [0], [0], [1], [0, 0, 1, 1], [], []>} : vector<8x8xbf16>, vector<8x32xbf16>, vector<8x32xf32> -> vector<8x32xf32>
    %40 = arith.addf %33, %39 : vector<8x32xf32>
    %41 = vector.extract_strided_slice %18 {offsets = [3, 0, 0], sizes = [1, 8, 8], strides = [1, 1, 1]} : vector<4x8x8xf32> to vector<1x8x8xf32>
    %42 = vector.shape_cast %41 : vector<1x8x8xf32> to vector<8x8xf32>
    %43 = arith.truncf %42 : vector<8x8xf32> to vector<8x8xbf16>
    %c3 = arith.constant 3 : index
    %c0_18 = arith.constant 0 : index
    %c0_19 = arith.constant 0 : index
    %44 = vector.load %arg8[%c3, %c0_18, %c0_19] : memref<4x8x32xbf16, #tpu.memory_space<vmem>>, vector<1x8x32xbf16>
    %45 = vector.shape_cast %44 : vector<1x8x32xbf16> to vector<8x32xbf16>
    %cst_20 = arith.constant dense<0.000000e+00> : vector<8x32xf32>
    %46 = tpu.matmul %43, %45, %cst_20 {dimension_numbers = #tpu.dot_dimension_numbers<[1], [0], [0], [1], [0, 0, 1, 1], [], []>} : vector<8x8xbf16>, vector<8x32xbf16>, vector<8x32xf32> -> vector<8x32xf32>
    %47 = arith.addf %40, %46 : vector<8x32xf32>
    %c0_21 = arith.constant 0 : index
    %c0_22 = arith.constant 0 : index
    %48 = vector.load %arg9[%c0_21, %c0_22] : memref<1x32xf32, #tpu.memory_space<vmem>>, vector<1x32xf32>
    %49 = vector.shape_cast %48 : vector<1x32xf32> to vector<32xf32>
    %50 = vector.shape_cast %49 : vector<32xf32> to vector<1x32xf32>
    %51 = vector.broadcast %50 : vector<1x32xf32> to vector<8x32xf32>
    %52 = arith.addf %47, %51 : vector<8x32xf32>
    %c0_23 = arith.constant 0 : index
    %c0_24 = arith.constant 0 : index
    %c0_25 = arith.constant 0 : index
    %53 = vector.load %arg3[%c0_23, %c0_24, %c0_25] : memref<1x8x32xf32, #tpu.memory_space<vmem>>, vector<1x8x32xf32>
    %54 = vector.shape_cast %53 : vector<1x8x32xf32> to vector<8x32xf32>
    %55 = arith.addf %54, %52 : vector<8x32xf32>
    %c0_26 = arith.constant 0 : index
    %c0_27 = arith.constant 0 : index
    %56 = vector.load %arg10[%c0_26, %c0_27] : memref<1x32xf32, #tpu.memory_space<vmem>>, vector<1x32xf32>
    %57 = vector.shape_cast %56 : vector<1x32xf32> to vector<32xf32>
    %c0_28 = arith.constant 0 : index
    %c0_29 = arith.constant 0 : index
    %58 = vector.load %arg11[%c0_28, %c0_29] : memref<1x32xf32, #tpu.memory_space<vmem>>, vector<1x32xf32>
    %59 = vector.shape_cast %58 : vector<1x32xf32> to vector<32xf32>
    %cst_30 = arith.constant dense<0.000000e+00> : vector<8xf32>
    %60 = vector.multi_reduction <add>, %55, %cst_30 [1] : vector<8x32xf32> to vector<8xf32>
    %61 = vector.shape_cast %60 : vector<8xf32> to vector<8x1xf32>
    %cst_31 = arith.constant 3.200000e+01 : f32
    %62 = vector.broadcast %cst_31 : f32 to vector<8x1xf32>
    %63 = arith.divf %61, %62 : vector<8x1xf32>
    %64 = vector.broadcast %63 : vector<8x1xf32> to vector<8x32xf32>
    %65 = arith.subf %55, %64 : vector<8x32xf32>
    %66 = arith.mulf %65, %65 : vector<8x32xf32>
    %cst_32 = arith.constant dense<0.000000e+00> : vector<8xf32>
    %67 = vector.multi_reduction <add>, %66, %cst_32 [1] : vector<8x32xf32> to vector<8xf32>
    %68 = vector.shape_cast %67 : vector<8xf32> to vector<8x1xf32>
    %cst_33 = arith.constant 3.200000e+01 : f32
    %69 = vector.broadcast %cst_33 : f32 to vector<8x1xf32>
    %70 = arith.divf %68, %69 : vector<8x1xf32>
    %71 = vector.broadcast %63 : vector<8x1xf32> to vector<8x32xf32>
    %72 = arith.subf %55, %71 : vector<8x32xf32>
    %cst_34 = arith.constant 9.99999974E-6 : f32
    %73 = vector.broadcast %cst_34 : f32 to vector<8x1xf32>
    %74 = arith.addf %70, %73 : vector<8x1xf32>
    %75 = math.rsqrt %74 : vector<8x1xf32>
    %76 = vector.broadcast %75 : vector<8x1xf32> to vector<8x32xf32>
    %77 = arith.mulf %72, %76 : vector<8x32xf32>
    %78 = vector.shape_cast %57 : vector<32xf32> to vector<1x32xf32>
    %79 = vector.broadcast %78 : vector<1x32xf32> to vector<8x32xf32>
    %80 = arith.mulf %77, %79 : vector<8x32xf32>
    %81 = vector.shape_cast %59 : vector<32xf32> to vector<1x32xf32>
    %82 = vector.broadcast %81 : vector<1x32xf32> to vector<8x32xf32>
    %83 = arith.addf %80, %82 : vector<8x32xf32>
    %84 = arith.truncf %83 : vector<8x32xf32> to vector<8x32xbf16>
    %cst_35 = arith.constant 0.000000e+00 : f32
    %85 = vector.broadcast %cst_35 : f32 to vector<8x32xf32>
    %c0_36 = arith.constant 0 : index
    %c0_37 = arith.constant 0 : index
    %86 = vector.load %arg12[%c0_36, %c0_37] : memref<32x128xbf16, #tpu.memory_space<vmem>>, vector<32x128xbf16>
    %cst_38 = arith.constant dense<0.000000e+00> : vector<8x128xf32>
    %87 = tpu.matmul %84, %86, %cst_38 {dimension_numbers = #tpu.dot_dimension_numbers<[1], [0], [0], [1], [0, 0, 1, 1], [], []>} : vector<8x32xbf16>, vector<32x128xbf16>, vector<8x128xf32> -> vector<8x128xf32>
    %c0_39 = arith.constant 0 : index
    %c0_40 = arith.constant 0 : index
    %88 = vector.load %arg13[%c0_39, %c0_40] : memref<1x128xf32, #tpu.memory_space<vmem>>, vector<1x128xf32>
    %89 = vector.shape_cast %88 : vector<1x128xf32> to vector<128xf32>
    %90 = vector.shape_cast %89 : vector<128xf32> to vector<1x128xf32>
    %91 = vector.broadcast %90 : vector<1x128xf32> to vector<8x128xf32>
    %92 = arith.addf %87, %91 : vector<8x128xf32>
    %cst_41 = arith.constant 5.000000e-01 : f32
    %93 = vector.broadcast %cst_41 : f32 to vector<8x128xf32>
    %94 = arith.mulf %93, %92 : vector<8x128xf32>
    %cst_42 = arith.constant 4.471500e-02 : f32
    %95 = vector.broadcast %cst_42 : f32 to vector<8x128xf32>
    %96 = arith.mulf %95, %92 : vector<8x128xf32>
    %97 = arith.mulf %96, %92 : vector<8x128xf32>
    %98 = arith.mulf %97, %92 : vector<8x128xf32>
    %99 = arith.addf %92, %98 : vector<8x128xf32>
    %cst_43 = arith.constant 0.797884583 : f32
    %100 = vector.broadcast %cst_43 : f32 to vector<8x128xf32>
    %101 = arith.mulf %100, %99 : vector<8x128xf32>
    %102 = math.tanh %101 : vector<8x128xf32>
    %cst_44 = arith.constant 1.000000e+00 : f32
    %103 = vector.broadcast %cst_44 : f32 to vector<8x128xf32>
    %104 = arith.addf %103, %102 : vector<8x128xf32>
    %105 = arith.mulf %94, %104 : vector<8x128xf32>
    %106 = arith.truncf %105 : vector<8x128xf32> to vector<8x128xbf16>
    %c0_45 = arith.constant 0 : index
    %c0_46 = arith.constant 0 : index
    %107 = vector.load %arg14[%c0_45, %c0_46] : memref<128x32xbf16, #tpu.memory_space<vmem>>, vector<128x32xbf16>
    %cst_47 = arith.constant dense<0.000000e+00> : vector<8x32xf32>
    %108 = tpu.matmul %106, %107, %cst_47 {dimension_numbers = #tpu.dot_dimension_numbers<[1], [0], [0], [1], [0, 0, 1, 1], [], []>} : vector<8x128xbf16>, vector<128x32xbf16>, vector<8x32xf32> -> vector<8x32xf32>
    %109 = arith.addf %85, %108 : vector<8x32xf32>
    %c0_48 = arith.constant 0 : index
    %c0_49 = arith.constant 0 : index
    %110 = vector.load %arg15[%c0_48, %c0_49] : memref<1x32xf32, #tpu.memory_space<vmem>>, vector<1x32xf32>
    %111 = vector.shape_cast %110 : vector<1x32xf32> to vector<32xf32>
    %112 = vector.shape_cast %111 : vector<32xf32> to vector<1x32xf32>
    %113 = vector.broadcast %112 : vector<1x32xf32> to vector<8x32xf32>
    %114 = arith.addf %109, %113 : vector<8x32xf32>
    %115 = arith.addf %55, %114 : vector<8x32xf32>
    %c0_50 = arith.constant 0 : index
    %c0_51 = arith.constant 0 : index
    %c0_52 = arith.constant 0 : index
    %116 = vector.load %arg16[%c0_50, %c0_51, %c0_52] : memref<1x8x32xf32, #tpu.memory_space<vmem>>, vector<1x8x32xf32>
    %117 = vector.shape_cast %116 : vector<1x8x32xf32> to vector<8x32xf32>
    %118 = vector.shape_cast %115 : vector<8x32xf32> to vector<1x8x32xf32>
    tpu.vector_store %arg16[%c0_50, %c0_51, %c0_52], %118 {strides = array<i32>} : memref<1x8x32xf32, #tpu.memory_space<vmem>>, vector<1x8x32xf32>,
    return
  }
  func.func @transform_0(%arg0: i32, %arg1: i32) -> (i32, i32, i32) {
    %c0_i32 = arith.constant 0 : i32
    %c0_i32_0 = arith.constant 0 : i32
    %c0_i32_1 = arith.constant 0 : i32
    return %arg0, %c0_i32, %c0_i32_0 : i32, i32, i32
  }
  func.func @transform_1(%arg0: i32, %arg1: i32) -> (i32, i32, i32) {
    %c0_i32 = arith.constant 0 : i32
    %c0_i32_0 = arith.constant 0 : i32
    return %arg0, %arg1, %c0_i32 : i32, i32, i32
  }
  func.func @transform_2(%arg0: i32, %arg1: i32) -> (i32, i32) {
    %c0_i32 = arith.constant 0 : i32
    %c0_i32_0 = arith.constant 0 : i32
    %c0_i32_1 = arith.constant 0 : i32
    return %c0_i32, %c0_i32_0 : i32, i32
  }
  func.func @transform_3(%arg0: i32, %arg1: i32) -> (i32, i32) {
    %c0_i32 = arith.constant 0 : i32
    %c0_i32_0 = arith.constant 0 : i32
    %c0_i32_1 = arith.constant 0 : i32
    return %c0_i32, %c0_i32_0 : i32, i32
  }
  func.func @transform_4(%arg0: i32, %arg1: i32) -> (i32, i32) {
    %c0_i32 = arith.constant 0 : i32
    %c0_i32_0 = arith.constant 0 : i32
    %c0_i32_1 = arith.constant 0 : i32
    return %c0_i32, %c0_i32_0 : i32, i32
  }
  func.func @transform_5(%arg0: i32, %arg1: i32) -> (i32, i32) {
    %c0_i32 = arith.constant 0 : i32
    %c0_i32_0 = arith.constant 0 : i32
    %c0_i32_1 = arith.constant 0 : i32
    return %c0_i32, %c0_i32_0 : i32, i32
  }
  func.func @transform_6(%arg0: i32, %arg1: i32) -> (i32, i32, i32) {
    %c0_i32 = arith.constant 0 : i32
    %c0_i32_0 = arith.constant 0 : i32
    %c0_i32_1 = arith.constant 0 : i32
    %c0_i32_2 = arith.constant 0 : i32
    return %c0_i32, %c0_i32_0, %c0_i32_1 : i32, i32, i32
  }
  func.func @transform_7(%arg0: i32, %arg1: i32) -> (i32, i32) {
    %c0_i32 = arith.constant 0 : i32
    %c0_i32_0 = arith.constant 0 : i32
    %c0_i32_1 = arith.constant 0 : i32
    return %c0_i32, %c0_i32_0 : i32, i32
  }
  func.func @transform_8(%arg0: i32, %arg1: i32) -> (i32, i32) {
    %c0_i32 = arith.constant 0 : i32
    %c0_i32_0 = arith.constant 0 : i32
    %c0_i32_1 = arith.constant 0 : i32
    return %c0_i32, %c0_i32_0 : i32, i32
  }
  func.func @transform_9(%arg0: i32, %arg1: i32) -> (i32, i32) {
    %c0_i32 = arith.constant 0 : i32
    %c0_i32_0 = arith.constant 0 : i32
    %c0_i32_1 = arith.constant 0 : i32
    return %c0_i32, %c0_i32_0 : i32, i32
  }
  func.func @transform_10(%arg0: i32, %arg1: i32) -> (i32, i32) {
    %c0_i32 = arith.constant 0 : i32
    %c0_i32_0 = arith.constant 0 : i32
    %c0_i32_1 = arith.constant 0 : i32
    return %c0_i32, %c0_i32_0 : i32, i32
  }
  func.func @transform_11(%arg0: i32, %arg1: i32) -> (i32, i32) {
    %c0_i32 = arith.constant 0 : i32
    %c0_i32_0 = arith.constant 0 : i32
    %c0_i32_1 = arith.constant 0 : i32
    return %c0_i32, %c0_i32_0 : i32, i32
  }
  func.func @transform_12(%arg0: i32, %arg1: i32) -> (i32, i32) {
    %c0_i32 = arith.constant 0 : i32
    %c0_i32_0 = arith.constant 0 : i32
    %c0_i32_1 = arith.constant 0 : i32
    return %c0_i32, %c0_i32_0 : i32, i32
  }
  func.func @transform_13(%arg0: i32, %arg1: i32) -> (i32, i32) {
    %c0_i32 = arith.constant 0 : i32
    %c0_i32_0 = arith.constant 0 : i32
    %c0_i32_1 = arith.constant 0 : i32
    return %c0_i32, %c0_i32_0 : i32, i32
  }
  func.func @transform_14(%arg0: i32, %arg1: i32) -> (i32, i32, i32) {
    %c0_i32 = arith.constant 0 : i32
    %c0_i32_0 = arith.constant 0 : i32
    return %arg0, %arg1, %c0_i32 : i32, i32, i32
  }
}

</mosaic_0001>

<bundles_post_ra>
// kernel: tpu_custom_call.1
= control target key start
LH: loop header
LB: loop body
LE: loop exit
PB: predicated region body
PF: predicated region fallthrough
CT: control target
= control target key end

     0   :  { %s4183_s0 = inlined_call_operand.hbm [shape: f32[2,8,32], index: 0, kind: input, shape index: {}]   ;;  %s4184_s1 = inlined_call_operand.hbm [shape: f32[2,8,32], index: 1, kind: input, shape index: {}]   ;;  %s4185_s2 = inlined_call_operand.hbm [shape: f32[1,32], index: 2, kind: input, shape index: {}]   ;;  %s4186_s3 = inlined_call_operand.hbm [shape: f32[1,32], index: 3, kind: input, shape index: {}]   ;;  %s4187_s4 = inlined_call_operand.hbm [shape: bf16[32,96], index: 4, kind: input, shape index: {}]   ;;  %s4188_s5 = inlined_call_operand.hbm [shape: f32[1,96], index: 5, kind: input, shape index: {}]   ;;  %s4189_s6 = inlined_call_operand.hbm [shape: bf16[4,8,32], index: 6, kind: input, shape index: {}]   ;;  %s4190_s7 = inlined_call_operand.hbm [shape: f32[1,32], index: 7, kind: input, shape index: {}]   ;;  %s4191_s8 = inlined_call_operand.hbm [shape: f32[1,32], index: 8, kind: input, shape index: {}]   ;;  %s4192_s9 = inlined_call_operand.hbm [shape: f32[1,32], index: 9, kind: input, shape index: {}]   ;;  %s4193_s10 = inlined_call_operand.hbm [shape: bf16[32,128], index: 10, kind: input, shape index: {}]   ;;  %s4194_s11 = inlined_call_operand.hbm [shape: f32[1,128], index: 11, kind: input, shape index: {}]   ;;  %s4195_s12 = inlined_call_operand.hbm [shape: bf16[128,32], index: 12, kind: input, shape index: {}]   ;;  %s4196_s13 = inlined_call_operand.hbm [shape: f32[1,32], index: 13, kind: input, shape index: {}]   ;;  %s4197_s14 = inlined_call_operand.hbm [shape: f32[2,8,32], index: 14, kind: output, shape index: {}]  }
   0x1   :  { %4209 = sst [smem:[#allocation42_spill]] %s4183_s0 }
   0x2   :  { %4210 = sst [smem:[#allocation43_spill]] %s4184_s1 }
   0x3   :  { %4211 = sst [smem:[#allocation44_spill]] %s4185_s2 }
   0x4   :  { %4212 = sst [smem:[#allocation45_spill]] %s4186_s3 }
   0x5   :  { %4213 = sst [smem:[#allocation46_spill]] %s4187_s4 }
   0x6   :  { %4214 = sst [smem:[#allocation47_spill]] %s4188_s5 }
   0x7   :  { %4215 = sst [smem:[#allocation48_spill]] %s4189_s6 }
   0x8   :  { %4216 = sst [smem:[#allocation49_spill]] %s4190_s7 }
   0x9   :  { %4217 = sst [smem:[#allocation50_spill]] %s4191_s8 }
   0xa   :  { %4218 = sst [smem:[#allocation51_spill]] %s4192_s9 }
   0xb   :  { %4219 = sst [smem:[#allocation52_spill]] %s4193_s10 }
   0xc   :  { %4220 = sst [smem:[#allocation53_spill]] %s4197_s14 }
   0xd   :  { %19 = vsyncpa [#allocation6], 0 }
   0xe   :  { %21 = vsyncpa [#allocation6 + $0x1], 0 }
   0xf   :  { %22 = vsyncpa [#allocation9], 0 }
  0x10   :  { %24 = vsyncpa [#allocation9 + $0x1], 0 }
  0x11   :  { %25 = vsyncpa [#allocation12], 0 }
  0x12   :  { %26 = vsyncpa [#allocation15], 0 }
  0x13   :  { %27 = vsyncpa [#allocation18], 0 }
  0x14   :  { %28 = vsyncpa [#allocation21], 0 }
  0x15   :  { %29 = vsyncpa [#allocation24], 0 }
  0x16   :  { %30 = vsyncpa [#allocation27], 0 }
  0x17   :  { %31 = vsyncpa [#allocation7], 0 }
  0x18   :  { %33 = vsyncpa [#allocation7 + $0x1], 0  ;;  %s3381_s29 = smov 0   ;;  %s3383_s30 = smov 0  }
  0x19   :  { %s3385_s15 = smov 0   ;;  %s3387_s16 = smov 0  }
  0x1a   :  { %s3389_s17 = smov 0   ;;  %s3391_s18 = smov 0  }
  0x1b LB: > { %4221 = sst [smem:[#allocation39_spill]] %s3212_s16  ;;  %s3412_s19 = sadd.s32 4294967295, %s3220_s18   ;;  %s3220_s18 = sphi %s3391_s18, %s39_s18   ;;  %s3216_s17 = sphi %s3389_s17, %s4289_s17   ;;  %s3212_s16 = sphi %s3387_s16, %s4288_s16   ;;  %s3208_s15 = sphi %s3385_s15, %s4287_s15   ;;  %s3204_s30 = sphi %s3383_s30, %s4286_s30   ;;  %s3200_s29 = sphi %s3381_s29, %s4285_s29  }
  0x1c   : > { %4222 = sst [smem:[#allocation40_spill]] %s3412_s19  ;;  %p2078_p0 = scmp.ge.s32.totalorder %s3220_s18, 1 }
  0x1d   : > { %p4201_p1 = scmp.eq.s32.totalorder %s3412_s19, 0  ;;  %p390_p2 = scmp.lt.s32.totalorder %s3220_s18, 3 }
  0x1e   : > { %s3274_s21 = smov [#allocation10]   ;;  %s3275_s23 = smov [#allocation11]  }
  0x1f   : > { %p3417_p3 = pnand %p2078_p0, %p390_p2  ;;  %s403_s22 = sshll.u32 %s3274_s21, 4  ;;  %s404_s22 = int_to_ptr.vmem [resolvable:$true] %s403_s22 }
  0x20   : > { %s414_s24 = sshll.u32 %s3275_s23, 4  ;;  %s3276_s26 = smov [#allocation14]   ;;  %s3430_s24 = int_to_ptr.vmem [resolvable:$true] %s414_s24 }
  0x21   : > { %s4223_s20 = scalar_select %p3417_p3, 1, 0 }
  0x22   : > { %p2361_p5 = pneg %p3417_p3  ;;  %s438_s27 = sshll.u32 %s3276_s26, 4  ;;  %s3432_s27 = int_to_ptr.vmem [resolvable:$true] %s438_s27 }
  0x23   : > { %4224 = sst [smem:[#allocation41_spill]] %s4223_s20  ;;  %s4226_s2 = sld [smem:[#allocation44_spill]] }
  0x24   : > { %p3426_p6 = pnand %p2361_p5, %p4201_p1 }
  0x26   : > { %p3442_p8 = pneg %p3426_p6 }
  0x29   : > { %s2658_s14 = scalar_lea.hbm %s4226_s2, 16 }
  0x2a   : > { %p2659_p7 = scmp.ne.s32.totalorder %s4226_s2, %s2658_s14  ;;  %p2665_p11 = scmp.lt.u32.totalorder %s2658_s14, %s4226_s2 }
  0x2c   : > { %p2661_p9 = pnand %p3442_p8, %p2659_p7 }
  0x2e   : > { %p2662_p10 = pneg %p2661_p9 }
  0x30   : > { %p2667_p12 = pnand %p2665_p11, %p2662_p10 }
  0x32   : > { %2670 = shalt.err (!%p2667_p12)
}
  0x33   : > { %s2671_s28 = scalar_lea.vmem %s404_s22, 16  ;;  %s2678_s16 = scalar_lea.vmem %s404_s22, 32 }
  0x34   : > { %p2672_p13 = scmp.ne.s32.totalorder %s404_s22, %s2671_s28  ;;  %p2679_p5 = scmp.lt.s32.totalorder %s404_s22, %s404_s22 }
  0x35   : > { %p2680_p4 = scmp.lt.s32.totalorder %s2678_s16, %s2671_s28 }
  0x36   : > { %p2674_p0 = pnand %p2672_p13, %p3442_p8 }
  0x37   : > { %p2681_p1 = por %p2680_p4, %p2679_p5 }
  0x38   : > { %p2675_p2 = pneg %p2674_p0 }
  0x3a   : > { %p2682_p3 = pnand %p2681_p1, %p2675_p2 }
  0x3c   : > { %2685 = shalt.err (!%p2682_p3)
}
  0x3d   : > { %2364 = dma.hbm_to_vmem [thread:$0]  (!%p3426_p6), %s4226_s2, 16, %s404_s22, [#allocation9]  }
  0x3e   : > { %s4228_s3 = sld [smem:[#allocation45_spill]] }
  0x44   : > { %s2686_s26 = scalar_lea.hbm %s4228_s3, 16 }
  0x45   : > { %p2687_p7 = scmp.ne.s32.totalorder %s4228_s3, %s2686_s26  ;;  %p2693_p1 = scmp.lt.u32.totalorder %s2686_s26, %s4228_s3 }
  0x47   : > { %p2689_p9 = pnand %p2687_p7, %p3442_p8 }
  0x49   : > { %p2690_p4 = pneg %p2689_p9 }
  0x4b   : > { %p2695_p3 = pnand %p2693_p1, %p2690_p4 }
  0x4d   : > { %2698 = shalt.err (!%p2695_p3)
}
  0x4e   : > { %s2699_s22 = scalar_lea.vmem %s3430_s24, 16  ;;  %s2706_s0 = scalar_lea.vmem %s3430_s24, 32 }
  0x4f   : > { %p2700_p10 = scmp.ne.s32.totalorder %s3430_s24, %s2699_s22  ;;  %p2707_p13 = scmp.lt.s32.totalorder %s3430_s24, %s3430_s24 }
  0x50   : > { %p2708_p0 = scmp.lt.s32.totalorder %s2706_s0, %s2699_s22 }
  0x51   : > { %p2702_p11 = pnand %p2700_p10, %p3442_p8 }
  0x52   : > { %p2709_p2 = por %p2708_p0, %p2707_p13 }
  0x53   : > { %p2703_p12 = pneg %p2702_p11 }
  0x55   : > { %p2710_p5 = pnand %p2709_p2, %p2703_p12 }
  0x57   : > { %2713 = shalt.err (!%p2710_p5)
}
  0x58   : > { %2367 = dma.hbm_to_vmem [thread:$0]  (!%p3426_p6), %s4228_s3, 16, %s3430_s24, [#allocation12]  }
  0x59   : > { %s4229_s5 = sld [smem:[#allocation47_spill]] }
  0x5f   : > { %s2714_s14 = scalar_lea.hbm %s4229_s5, 16 }
  0x60   : > { %p2715_p7 = scmp.ne.s32.totalorder %s4229_s5, %s2714_s14  ;;  %p2721_p1 = scmp.lt.u32.totalorder %s2714_s14, %s4229_s5 }
  0x62   : > { %p2717_p9 = pnand %p2715_p7, %p3442_p8 }
  0x64   : > { %p2718_p4 = pneg %p2717_p9 }
  0x66   : > { %p2723_p3 = pnand %p2721_p1, %p2718_p4 }
  0x68   : > { %2726 = shalt.err (!%p2723_p3)
}
  0x69   : > { %s2727_s24 = scalar_lea.vmem %s3432_s27, 16  ;;  %s2734_s0 = scalar_lea.vmem %s3432_s27, 32 }
  0x6a   : > { %p2728_p10 = scmp.ne.s32.totalorder %s3432_s27, %s2727_s24  ;;  %p2735_p13 = scmp.lt.s32.totalorder %s3432_s27, %s3432_s27 }
  0x6b   : > { %p2736_p0 = scmp.lt.s32.totalorder %s2734_s0, %s2727_s24 }
  0x6c   : > { %p2730_p11 = pnand %p2728_p10, %p3442_p8 }
  0x6d   : > { %p2737_p2 = por %p2736_p0, %p2735_p13 }
  0x6e   : > { %p2731_p12 = pneg %p2730_p11 }
  0x70   : > { %p2738_p5 = pnand %p2737_p2, %p2731_p12 }
  0x72   : > { %2741 = shalt.err (!%p2738_p5)
}
  0x73   : > { %2373 = dma.hbm_to_vmem [thread:$0]  (!%p3426_p6), %s4229_s5, 16, %s3432_s27, [#allocation15]  }
  0x74   : > { %s3277_s21 = smov [#allocation17]   ;;  %s3278_s14 = smov [#allocation20]  }
  0x75   : > { %s462_s1 = sshll.u32 %s3277_s21, 4  ;;  %s484_s26 = sshll.u32 %s3278_s14, 4  ;;  %s463_s1 = int_to_ptr.vmem [resolvable:$true] %s462_s1  ;;  %s485_s26 = int_to_ptr.vmem [resolvable:$true] %s484_s26 }
  0x76   : > { %s4230_s7 = sld [smem:[#allocation49_spill]] }
  0x7c   : > { %s2742_s22 = scalar_lea.hbm %s4230_s7, 16 }
  0x7d   : > { %p2743_p7 = scmp.ne.s32.totalorder %s4230_s7, %s2742_s22  ;;  %p2749_p1 = scmp.lt.u32.totalorder %s2742_s22, %s4230_s7 }
  0x7f   : > { %p2745_p9 = pnand %p2743_p7, %p3442_p8 }
  0x81   : > { %p2746_p4 = pneg %p2745_p9 }
  0x83   : > { %p2751_p3 = pnand %p2749_p1, %p2746_p4 }
  0x85   : > { %2754 = shalt.err (!%p2751_p3)
}
  0x86   : > { %s2755_s27 = scalar_lea.vmem %s463_s1, 16  ;;  %s2762_s20 = scalar_lea.vmem %s463_s1, 32 }
  0x87   : > { %p2756_p10 = scmp.ne.s32.totalorder %s463_s1, %s2755_s27  ;;  %p2763_p13 = scmp.lt.s32.totalorder %s463_s1, %s463_s1 }
  0x88   : > { %p2764_p0 = scmp.lt.s32.totalorder %s2762_s20, %s2755_s27 }
  0x89   : > { %p2758_p11 = pnand %p2756_p10, %p3442_p8 }
  0x8a   : > { %p2765_p2 = por %p2764_p0, %p2763_p13 }
  0x8b   : > { %p2759_p12 = pneg %p2758_p11 }
  0x8d   : > { %p2766_p5 = pnand %p2765_p2, %p2759_p12 }
  0x8f   : > { %2769 = shalt.err (!%p2766_p5)
}
  0x90   : > { %2379 = dma.hbm_to_vmem [thread:$0]  (!%p3426_p6), %s4230_s7, 16, %s463_s1, [#allocation18]  }
  0x91   : > { %s4231_s9 = sld [smem:[#allocation51_spill]] }
  0x97   : > { %s2770_s16 = scalar_lea.hbm %s4231_s9, 16 }
  0x98   : > { %p2771_p7 = scmp.ne.s32.totalorder %s4231_s9, %s2770_s16  ;;  %p2777_p1 = scmp.lt.u32.totalorder %s2770_s16, %s4231_s9 }
  0x9a   : > { %p2773_p9 = pnand %p2771_p7, %p3442_p8 }
  0x9c   : > { %p2774_p4 = pneg %p2773_p9 }
  0x9e   : > { %p2779_p3 = pnand %p2777_p1, %p2774_p4 }
  0xa0   : > { %2782 = shalt.err (!%p2779_p3)
}
  0xa1   : > { %s2783_s27 = scalar_lea.vmem %s485_s26, 16  ;;  %s2790_s1 = scalar_lea.vmem %s485_s26, 32 }
  0xa2   : > { %p2784_p10 = scmp.ne.s32.totalorder %s485_s26, %s2783_s27  ;;  %p2791_p13 = scmp.lt.s32.totalorder %s485_s26, %s485_s26 }
  0xa3   : > { %p2792_p0 = scmp.lt.s32.totalorder %s2790_s1, %s2783_s27 }
  0xa4   : > { %p2786_p11 = pnand %p2784_p10, %p3442_p8 }
  0xa5   : > { %p2793_p2 = por %p2792_p0, %p2791_p13 }
  0xa6   : > { %p2787_p12 = pneg %p2786_p11 }
  0xa8   : > { %p2794_p5 = pnand %p2793_p2, %p2787_p12 }
  0xaa   : > { %2797 = shalt.err (!%p2794_p5)
}
  0xab   : > { %2385 = dma.hbm_to_vmem [thread:$0]  (!%p3426_p6), %s4231_s9, 16, %s485_s26, [#allocation21]  }
  0xac   : > { %s3279_s14 = smov [#allocation23]   ;;  %s3280_s28 = smov [#allocation13]  }
  0xad   : > { %s508_s2 = sshll.u32 %s3279_s14, 4  ;;  %s424_s16 = sshll.u32 %s3280_s28, 4  ;;  %s509_s2 = int_to_ptr.vmem [resolvable:$true] %s508_s2  ;;  %s425_s16 = int_to_ptr.vmem [resolvable:$true] %s424_s16 }
  0xae   : > { %s2798_s0 = scalar_lea.hbm %s4194_s11, 16 }
  0xaf   : > { %p2799_p7 = scmp.ne.s32.totalorder %s4194_s11, %s2798_s0  ;;  %p2805_p1 = scmp.lt.u32.totalorder %s2798_s0, %s4194_s11 }
  0xb1   : > { %p2801_p9 = pnand %p2799_p7, %p3442_p8 }
  0xb3   : > { %p2802_p4 = pneg %p2801_p9 }
  0xb5   : > { %p2807_p3 = pnand %p2805_p1, %p2802_p4 }
  0xb7   : > { %2810 = shalt.err (!%p2807_p3)
}
  0xb8   : > { %s2811_s26 = scalar_lea.vmem %s509_s2, 16  ;;  %s2818_s21 = scalar_lea.vmem %s509_s2, 32 }
  0xb9   : > { %p2812_p10 = scmp.ne.s32.totalorder %s509_s2, %s2811_s26  ;;  %p2819_p13 = scmp.lt.s32.totalorder %s509_s2, %s509_s2 }
  0xba   : > { %p2820_p0 = scmp.lt.s32.totalorder %s2818_s21, %s2811_s26 }
  0xbb   : > { %p2814_p11 = pnand %p2812_p10, %p3442_p8 }
  0xbc   : > { %p2821_p2 = por %p2820_p0, %p2819_p13 }
  0xbd   : > { %p2815_p12 = pneg %p2814_p11 }
  0xbf   : > { %p2822_p5 = pnand %p2821_p2, %p2815_p12 }
  0xc1   : > { %2825 = shalt.err (!%p2822_p5)
}
  0xc2   : > { %2391 = dma.hbm_to_vmem [thread:$0]  (!%p3426_p6), %s4194_s11, 16, %s509_s2, [#allocation24]  }
  0xc3   : > { %s4232_s4 = sld [smem:[#allocation46_spill]] }
  0xc9   : > { %s2826_s0 = scalar_lea.hbm %s4232_s4, 256 }
  0xca   : > { %p2827_p7 = scmp.ne.s32.totalorder %s4232_s4, %s2826_s0  ;;  %p2833_p1 = scmp.lt.u32.totalorder %s2826_s0, %s4232_s4 }
  0xcc   : > { %p2829_p9 = pnand %p2827_p7, %p3442_p8 }
  0xce   : > { %p2830_p4 = pneg %p2829_p9 }
  0xd0   : > { %p2835_p3 = pnand %p2833_p1, %p2830_p4 }
  0xd2   : > { %2838 = shalt.err (!%p2835_p3)
}
  0xd3   : > { %s2839_s26 = scalar_lea.vmem %s425_s16, 256  ;;  %p2847_p13 = scmp.lt.s32.totalorder %s425_s16, %s425_s16 }
  0xd4   : > { %p2840_p10 = scmp.ne.s32.totalorder %s425_s16, %s2839_s26  ;;  %p2848_p0 = scmp.lt.s32.totalorder %s2839_s26, %s2839_s26 }
  0xd6   : > { %p2842_p11 = pnand %p2840_p10, %p3442_p8  ;;  %p2849_p2 = por %p2848_p0, %p2847_p13 }
  0xd8   : > { %p2843_p12 = pneg %p2842_p11 }
  0xda   : > { %p2850_p5 = pnand %p2849_p2, %p2843_p12 }
  0xdc   : > { %2853 = shalt.err (!%p2850_p5)
}
  0xdd   : > { %s3281_s2 = smov 64   ;;  %s3282_s21 = smov 4  }
  0xde   : > { %2370 = dma.hbm_to_vmem [thread:$0]  (!%p3426_p6), %s4232_s4, 256, %s425_s16, [#allocation12], %s3281_s2, %s3281_s2, %s3282_s21  }
  0xdf   : > { %s3283_s22 = smov [#allocation16]   ;;  %s3284_s0 = smov [#allocation19]  }
  0xe0   : > { %s448_s24 = sshll.u32 %s3283_s22, 4  ;;  %s473_s19 = sshll.u32 %s3284_s0, 4  ;;  %s449_s24 = int_to_ptr.vmem [resolvable:$true] %s448_s24  ;;  %s474_s19 = int_to_ptr.vmem [resolvable:$true] %s473_s19 }
  0xe1   : > { %s4233_s6 = sld [smem:[#allocation48_spill]] }
  0xe7   : > { %s2854_s20 = scalar_lea.hbm %s4233_s6, 256 }
  0xe8   : > { %p2855_p7 = scmp.ne.s32.totalorder %s4233_s6, %s2854_s20  ;;  %p2861_p1 = scmp.lt.u32.totalorder %s2854_s20, %s4233_s6 }
  0xea   : > { %p2857_p9 = pnand %p2855_p7, %p3442_p8 }
  0xec   : > { %p2858_p4 = pneg %p2857_p9 }
  0xee   : > { %p2863_p3 = pnand %p2861_p1, %p2858_p4 }
  0xf0   : > { %2866 = shalt.err (!%p2863_p3)
}
  0xf1   : > { %s2867_s16 = scalar_lea.vmem %s449_s24, 256  ;;  %p2875_p13 = scmp.lt.s32.totalorder %s449_s24, %s449_s24 }
  0xf2   : > { %p2868_p10 = scmp.ne.s32.totalorder %s449_s24, %s2867_s16  ;;  %p2876_p0 = scmp.lt.s32.totalorder %s2867_s16, %s2867_s16 }
  0xf4   : > { %p2870_p11 = pnand %p2868_p10, %p3442_p8  ;;  %p2877_p2 = por %p2876_p0, %p2875_p13 }
  0xf6   : > { %p2871_p12 = pneg %p2870_p11 }
  0xf8   : > { %p2878_p5 = pnand %p2877_p2, %p2871_p12 }
  0xfa   : > { %2881 = shalt.err (!%p2878_p5)
}
  0xfb   : > { %2376 = dma.hbm_to_vmem [thread:$0]  (!%p3426_p6), %s4233_s6, 256, %s449_s24, [#allocation15], %s3281_s2, %s3281_s2, %s3282_s21  }
  0xfc   : > { %s4234_s8 = sld [smem:[#allocation50_spill]] }
 0x102   : > { %s2882_s28 = scalar_lea.hbm %s4234_s8, 16 }
 0x103   : > { %p2883_p7 = scmp.ne.s32.totalorder %s4234_s8, %s2882_s28  ;;  %p2889_p1 = scmp.lt.u32.totalorder %s2882_s28, %s4234_s8 }
 0x105   : > { %p2885_p9 = pnand %p2883_p7, %p3442_p8 }
 0x107   : > { %p2886_p4 = pneg %p2885_p9 }
 0x109   : > { %p2891_p3 = pnand %p2889_p1, %p2886_p4 }
 0x10b   : > { %2894 = shalt.err (!%p2891_p3)
}
 0x10c   : > { %s2895_s20 = scalar_lea.vmem %s474_s19, 16  ;;  %s2902_s24 = scalar_lea.vmem %s474_s19, 32 }
 0x10d   : > { %p2896_p10 = scmp.ne.s32.totalorder %s474_s19, %s2895_s20  ;;  %p2903_p13 = scmp.lt.s32.totalorder %s474_s19, %s474_s19 }
 0x10e   : > { %p2904_p0 = scmp.lt.s32.totalorder %s2902_s24, %s2895_s20 }
 0x10f   : > { %p2898_p11 = pnand %p2896_p10, %p3442_p8 }
 0x110   : > { %p2905_p2 = por %p2904_p0, %p2903_p13 }
 0x111   : > { %p2899_p12 = pneg %p2898_p11 }
 0x113   : > { %p2906_p5 = pnand %p2905_p2, %p2899_p12 }
 0x115   : > { %2909 = shalt.err (!%p2906_p5)
}
 0x116   : > { %2382 = dma.hbm_to_vmem [thread:$0]  (!%p3426_p6), %s4234_s8, 16, %s474_s19, [#allocation18]  }
 0x117   : > { %s3285_s3 = smov [#allocation22]   ;;  %s3286_s7 = smov [#allocation25]  }
 0x118   : > { %s494_s5 = sshll.u32 %s3285_s3, 4  ;;  %s518_s14 = sshll.u32 %s3286_s7, 4  ;;  %s495_s5 = int_to_ptr.vmem [resolvable:$true] %s494_s5  ;;  %s519_s14 = int_to_ptr.vmem [resolvable:$true] %s518_s14 }
 0x119   : > { %s4235_s10 = sld [smem:[#allocation52_spill]] }
 0x11f   : > { %s2910_s0 = scalar_lea.hbm %s4235_s10, 256 }
 0x120   : > { %p2911_p7 = scmp.ne.s32.totalorder %s4235_s10, %s2910_s0  ;;  %p2917_p1 = scmp.lt.u32.totalorder %s2910_s0, %s4235_s10 }
 0x122   : > { %p2913_p9 = pnand %p2911_p7, %p3442_p8 }
 0x124   : > { %p2914_p4 = pneg %p2913_p9 }
 0x126   : > { %p2919_p3 = pnand %p2917_p1, %p2914_p4 }
 0x128   : > { %2922 = shalt.err (!%p2919_p3)
}
 0x129   : > { %s2923_s19 = scalar_lea.vmem %s495_s5, 256  ;;  %p2931_p13 = scmp.lt.s32.totalorder %s495_s5, %s495_s5 }
 0x12a   : > { %p2924_p10 = scmp.ne.s32.totalorder %s495_s5, %s2923_s19  ;;  %p2932_p0 = scmp.lt.s32.totalorder %s2923_s19, %s2923_s19 }
 0x12c   : > { %p2926_p11 = pnand %p2924_p10, %p3442_p8  ;;  %p2933_p2 = por %p2932_p0, %p2931_p13 }
 0x12e   : > { %p2927_p12 = pneg %p2926_p11 }
 0x130   : > { %p2934_p5 = pnand %p2933_p2, %p2927_p12 }
 0x132   : > { %2937 = shalt.err (!%p2934_p5)
}
 0x133   : > { %2388 = dma.hbm_to_vmem [thread:$0]  (!%p3426_p6), %s4235_s10, 256, %s495_s5, [#allocation21], %s3281_s2, %s3281_s2, %s3282_s21  }
 0x134   : > { %s2938_s28 = scalar_lea.hbm %s4195_s12, 1024 }
 0x135   : > { %p2939_p7 = scmp.ne.s32.totalorder %s4195_s12, %s2938_s28  ;;  %p2945_p1 = scmp.lt.u32.totalorder %s2938_s28, %s4195_s12 }
 0x137   : > { %p2941_p9 = pnand %p2939_p7, %p3442_p8 }
 0x139   : > { %p2942_p4 = pneg %p2941_p9 }
 0x13b   : > { %p2947_p3 = pnand %p2945_p1, %p2942_p4 }
 0x13d   : > { %2950 = shalt.err (!%p2947_p3)
}
 0x13e   : > { %s2951_s20 = scalar_lea.vmem %s519_s14, 1024  ;;  %p2959_p13 = scmp.lt.s32.totalorder %s519_s14, %s519_s14 }
 0x13f   : > { %p2952_p10 = scmp.ne.s32.totalorder %s519_s14, %s2951_s20  ;;  %p2960_p0 = scmp.lt.s32.totalorder %s2951_s20, %s2951_s20 }
 0x141   : > { %p2954_p11 = pnand %p2952_p10, %p3442_p8  ;;  %p2961_p2 = por %p2960_p0, %p2959_p13 }
 0x143   : > { %p2955_p12 = pneg %p2954_p11 }
 0x145   : > { %p2962_p5 = pnand %p2961_p2, %p2955_p12 }
 0x147   : > { %2965 = shalt.err (!%p2962_p5)
}
 0x148   : > { %2394 = dma.hbm_to_vmem [thread:$0]  (!%p3426_p6), %s4195_s12, 1024, %s519_s14, [#allocation24], %s3281_s2, %s3281_s2, %s3282_s21  }
 0x149   : > { %s3287_s19 = smov [#allocation26]   ;;  %s2966_s7 = scalar_lea.hbm %s4196_s13, 16 }
 0x14a   : > { %s532_s26 = sshll.u32 %s3287_s19, 4  ;;  %p2967_p7 = scmp.ne.s32.totalorder %s4196_s13, %s2966_s7  ;;  %s533_s26 = int_to_ptr.vmem [resolvable:$true] %s532_s26 }
 0x14b   : > { %p2973_p1 = scmp.lt.u32.totalorder %s2966_s7, %s4196_s13 }
 0x14c   : > { %p2969_p9 = pnand %p2967_p7, %p3442_p8 }
 0x14e   : > { %p2970_p4 = pneg %p2969_p9 }
 0x150   : > { %p2975_p3 = pnand %p2973_p1, %p2970_p4 }
 0x152   : > { %2978 = shalt.err (!%p2975_p3)
}
 0x153   : > { %s2979_s2 = scalar_lea.vmem %s533_s26, 16  ;;  %s2986_s21 = scalar_lea.vmem %s533_s26, 32 }
 0x154   : > { %p2980_p10 = scmp.ne.s32.totalorder %s533_s26, %s2979_s2  ;;  %p2987_p13 = scmp.lt.s32.totalorder %s533_s26, %s533_s26 }
 0x155   : > { %p2988_p0 = scmp.lt.s32.totalorder %s2986_s21, %s2979_s2 }
 0x156   : > { %p2982_p11 = pnand %p2980_p10, %p3442_p8 }
 0x157   : > { %p2989_p2 = por %p2988_p0, %p2987_p13 }
 0x158   : > { %p2983_p12 = pneg %p2982_p11 }
 0x15a   : > { %p2990_p5 = pnand %p2989_p2, %p2983_p12 }
 0x15c   : > { %2993 = shalt.err (!%p2990_p5)
}
 0x15d   : > { %s4236_s23 = sld [smem:[#allocation40_spill]]  ;;  %s2077_s20 = sadd.s32 4294967294, %s3220_s18  }
 0x15e   : > { %2397 = dma.hbm_to_vmem [thread:$0]  (!%p3426_p6), %s4196_s13, 16, %s533_s26, [#allocation27]  }
 0x15f   : > { %s51_s5 = sadd.s32 1, %s3216_s17  ;;  %s58_s25 = sadd.s32 1, %s3208_s15 }
 0x160   : > { %p53_p8 = scmp.ge.s32.totalorder %s51_s5, 2  ;;  %p65_p7 = scmp.ne.s32.totalorder %s3208_s15, %s3204_s30 }
 0x161   : > { %p66_p9 = scmp.eq.s32.totalorder %s3220_s18, 0  ;;  %p71_p1 = scmp.ne.s32.totalorder %s3204_s30, %s3200_s29 }
 0x162   : > { %s4291_s5 = smov (%p53_p8, %s51_s5), 0  ;;  %p383_p13 = scmp.eq.s32.totalorder %s2077_s20, 1 }
 0x163   : > { %p3688_p4 = por %p66_p9, %p65_p7  ;;  %s55_s19 = ssub.s32 %s3216_s17, %s4291_s5 }
 0x164   : > { %p377_p6 = scmp.eq.s32.totalorder %s4236_s23, 1  ;;  %p56_p3 = scmp.eq.s32.totalorder %s55_s19, 0 }
 0x165   : > { %p4238_p10 = scmp.eq.s32.totalorder %s4236_s23, 0  ;;  %p3710_p0 = por %p383_p13, %p71_p1 }
 0x166   : > { %p3703_p12 = por %p377_p6, %p65_p7  ;;  %p2421_p2 = scmp.lt.s32.totalorder %s3220_s18, 2 }
 0x167   : > { %p3699_p11 = por %p4238_p10, %p71_p1  ;;  %s543_s28 = sand.u32 1, %s3208_s15  }
 0x168   : > { %s4240_s16 = scalar_select %p3703_p12, 1, 0 }
 0x169   : > { %s4239_s26 = scalar_select %p3699_p11, 1, 0 }
 0x16a   : > { %s3708_s3 = scalar_select %p56_p3, %s3208_s15, %s58_s25  }
 0x16b   : > { %s4241_s7 = scalar_select %p3710_p0, 1, 0 }
 0x16c   : > { %s2093_s22 = sshll.u32 %s3216_s17, 7  ;;  %s3717_s0 = sshll.u32 %s543_s28, 3 }
 0x16d   : > { %s4242_s21 = sld [smem:[#allocation42_spill]]  ;;  %s547_s1 = scalar_lea.vmem [#allocation5], %s3717_s0 }
 0x16e   : > { %s554_s23 = sshll.u32 %s547_s1, 4  ;;  %p3727_p5 = pnand %p2421_p2, %p3688_p4  ;;  %s3731_s23 = int_to_ptr.vmem [resolvable:$true] %s554_s23 }
 0x16f   : > { %s4244_s27 = sld [smem:[#allocation43_spill]]  ;;  %s544_s4 = scalar_lea.sflag [#allocation6], %s543_s28 }
 0x170   : > { %p2996_p7 = pneg %p3727_p5 }
 0x173   : > { %s3722_s14 = scalar_lea.hbm %s4242_s21, %s2093_s22  ;;  %s2999_s8 = scalar_lea.hbm %s4242_s21, 256 }
 0x174   : > { %s2994_s6 = scalar_lea.hbm %s3722_s14, 128  ;;  %p3000_p1 = scmp.lt.u32.totalorder %s3722_s14, %s4242_s21 }
 0x175   : > { %s3736_s2 = scalar_lea.hbm %s4244_s27, %s2093_s22  ;;  %p2995_p8 = scmp.ne.s32.totalorder %s3722_s14, %s2994_s6 }
 0x176   : > { %p3001_p6 = scmp.lt.u32.totalorder %s2999_s8, %s2994_s6  ;;  %p3003_p10 = scmp.lt.u32.totalorder %s2994_s6, %s3722_s14 }
 0x177   : > { %p2997_p9 = pnand %p2996_p7, %p2995_p8 }
 0x178   : > { %p3002_p3 = por %p3001_p6, %p3000_p1 }
 0x179   : > { %p2998_p4 = pneg %p2997_p9 }
 0x17a   : > { %p3004_p13 = por %p3003_p10, %p3002_p3 }
 0x17c   : > { %p3005_p2 = pnand %p3004_p13, %p2998_p4 }
 0x17e   : > { %3008 = shalt.err (!%p3005_p2)
}
 0x17f   : > { %s3009_s28 = scalar_lea.vmem %s3731_s23, 128  ;;  %s3288_s22 = smov [#allocation5]  }
 0x180   : > { %p3010_p8 = scmp.ne.s32.totalorder %s3731_s23, %s3009_s28  ;;  %s3014_s25 = sshll.u32 %s3288_s22, 4  ;;  %s3015_s25 = int_to_ptr.vmem [resolvable:$false] %s3014_s25 }
 0x181   : > { %s3016_s9 = scalar_lea.vmem %s3015_s25, 256  ;;  %p3017_p12 = scmp.lt.s32.totalorder %s3731_s23, %s3015_s25 }
 0x182   : > { %p3012_p9 = pnand %p3010_p8, %p2996_p7  ;;  %p3018_p1 = scmp.lt.s32.totalorder %s3016_s9, %s3009_s28 }
 0x184   : > { %p3013_p0 = pneg %p3012_p9  ;;  %p3019_p6 = por %p3018_p1, %p3017_p12 }
 0x186   : > { %p3020_p3 = pnand %p3019_p6, %p3013_p0 }
 0x188   : > { %3023 = shalt.err (!%p3020_p3)
}
 0x189   : > { %2401 = dma.hbm_to_vmem [thread:$0]  (!%p3727_p5), %s3722_s14, 128, %s3731_s23, %s544_s4  }
 0x18a   : > { %s561_s6 = sand.u32 1, %s3220_s18   ;;  %s565_s8 = scalar_lea.vmem [#allocation8], %s3717_s0 }
 0x18b   : > { %s573_s10 = sshll.u32 %s565_s8, 4  ;;  %s562_s19 = scalar_lea.sflag [#allocation9], %s561_s6  ;;  %s574_s10 = int_to_ptr.vmem [resolvable:$true] %s573_s10 }
 0x18c   : > { %s3024_s24 = scalar_lea.hbm %s3736_s2, 128  ;;  %s3029_s22 = scalar_lea.hbm %s4244_s27, 256 }
 0x18d   : > { %p3025_p12 = scmp.ne.s32.totalorder %s3736_s2, %s3024_s24  ;;  %p3030_p10 = scmp.lt.u32.totalorder %s3736_s2, %s4244_s27 }
 0x18e   : > { %p3031_p13 = scmp.lt.u32.totalorder %s3029_s22, %s3024_s24  ;;  %p3033_p8 = scmp.lt.u32.totalorder %s3024_s24, %s3736_s2 }
 0x18f   : > { %p3027_p0 = pnand %p3025_p12, %p2996_p7 }
 0x190   : > { %p3032_p2 = por %p3031_p13, %p3030_p10 }
 0x191   : > { %p3028_p4 = pneg %p3027_p0 }
 0x192   : > { %p3034_p9 = por %p3033_p8, %p3032_p2 }
 0x194   : > { %p3035_p1 = pnand %p3034_p9, %p3028_p4 }
 0x196   : > { %3038 = shalt.err (!%p3035_p1)
}
 0x197   : > { %s3039_s4 = scalar_lea.vmem %s574_s10, 128  ;;  %s3289_s0 = smov [#allocation8]  }
 0x198   : > { %p3040_p6 = scmp.ne.s32.totalorder %s574_s10, %s3039_s4  ;;  %s3044_s14 = sshll.u32 %s3289_s0, 4  ;;  %s3045_s14 = int_to_ptr.vmem [resolvable:$false] %s3044_s14 }
 0x199   : > { %s3046_s23 = scalar_lea.vmem %s3045_s14, 256  ;;  %p3047_p0 = scmp.lt.s32.totalorder %s574_s10, %s3045_s14 }
 0x19a   : > { %p3042_p3 = pnand %p3040_p6, %p2996_p7  ;;  %p3048_p11 = scmp.lt.s32.totalorder %s3046_s23, %s3039_s4 }
 0x19c   : > { %p3043_p12 = pneg %p3042_p3  ;;  %p3049_p10 = por %p3048_p11, %p3047_p0 }
 0x19e   : > { %p3050_p13 = pnand %p3049_p10, %p3043_p12 }
 0x1a0   : > { %3053 = shalt.err (!%p3050_p13)
}
 0x1a1   : > { %2404 = dma.hbm_to_vmem [thread:$0]  (!%p3727_p5), %s3736_s2, 128, %s574_s10, %s562_s19  }
 0x1a2   : > { %s4245_s6 = sld [smem:[#allocation41_spill]] }
 0x1a8   : > { %p4246_p4 = scmp.ne.s32.totalorder %s4245_s6, 0 }
 0x1a9   : > { %s3787_s8 = sand.u32 (!%p4246_p4), 1, %s3204_s30   ;;  %p4247_p11 = scmp.ne.s32.totalorder (!%p4246_p4), %s4239_s26, 0 }
 0x1aa   : > { %582 = sbr.rel (%p4246_p4) target bundleno = 2785 (0xae1), region = 76  ;;  %s3790_s24 = sshll.u32 (!%p4246_p4), %s3787_s8, 3 }
 0x1ab   : > { %s585_s1 = scalar_lea.sflag (!%p4246_p4), [#allocation6], %s3787_s8  ;;  %s588_s28 = scalar_lea.vmem (!%p4246_p4), [#allocation5], %s3790_s24 }
 0x1b1   : > { %3159 = dma.done.wait (%p4247_p11), %s585_s1, 128  }
 0x1b2   : > { %3161 = vsyncadd (%p4247_p11), %s585_s1, 4294967168  ;;  %s4248_s20 = sld [smem:[#allocation40_spill]]  ;;  %s597_s19 = scalar_lea.vmem [#allocation8], %s3790_s24 }
 0x1b8   : > { %s593_s2 = sand.u32 1, %s4248_s20  }
 0x1b9   : > { %s594_s10 = scalar_lea.sflag [#allocation9], %s593_s2 }
 0x1ba   : > { %3163 = dma.done.wait (%p4247_p11), %s594_s10, 128  }
 0x1bb   : > { %3165 = vsyncadd (%p4247_p11), %s594_s10, 4294967168  ;;  %p4249_p5 = scmp.eq.s32.totalorder %s4248_s20, 0 }
 0x1bd   : > { %3167 = dma.done.wait (%p4249_p5), [#allocation9], 16   ;;  %p4250_p7 = pmov %p4249_p5 }
 0x1be   : > { %p4251_p2 = pmov %p4249_p5 }
 0x1bf   : > { %3169 = vsyncadd (%p4250_p7), [#allocation9], 4294967280 }
 0x1c0   : > { %3171 = dma.done.wait (%p4251_p2), [#allocation12], 272   ;;  %p4252_p8 = pmov %p4251_p2 }
 0x1c1   : > { %p4253_p9 = pmov %p4251_p2 }
 0x1c2   : > { %3173 = vsyncadd (%p4252_p8), [#allocation12], 4294967024 }
 0x1c3   : > { %3175 = dma.done.wait (%p4253_p9), [#allocation15], 272   ;;  %p4254_p1 = pmov %p4251_p2 }
 0x1c5   : > { %3177 = vsyncadd (%p4254_p1), [#allocation15], 4294967024  ;;  %p4255_p6 = pmov %p4254_p1 }
 0x1c6   : > { %p4256_p3 = pmov %p4254_p1 }
 0x1c7   : > { %3179 = dma.done.wait (%p4255_p6), [#allocation18], 32  }
 0x1c8   : > { %3181 = vsyncadd (%p4256_p3), [#allocation18], 4294967264  ;;  %p4257_p12 = pmov %p4254_p1 }
 0x1c9   : > { %p4258_p0 = pmov %p4254_p1 }
 0x1ca   : > { %3183 = dma.done.wait (%p4257_p12), [#allocation21], 272  }
 0x1cb   : > { %3185 = vsyncadd (%p4258_p0), [#allocation21], 4294967024  ;;  %p4259_p10 = pmov %p4258_p0 }
 0x1cc   : > { %p4260_p13 = pmov %p4258_p0 }
 0x1cd   : > { %3187 = dma.done.wait (%p4259_p10), [#allocation24], 1040  }
 0x1ce   : > { %3189 = vsyncadd (%p4260_p13), [#allocation24], 4294966256  ;;  %p4261_p4 = pmov %p4258_p0 }
 0x1cf   : > { %p4262_p11 = pmov %p4258_p0 }
 0x1d0   : > { %3191 = dma.done.wait (%p4261_p4), [#allocation27], 16  }
 0x1d1   : > { %3193 = vsyncadd (%p4262_p11), [#allocation27], 4294967280  ;;  %vm703_vm0 = vcmask 261120   ;;  %v700_v0 = vld [vmem:[%s588_s28] sm:$0xff]  ;;  %v3290_v8 = vmov 0.0   ;;  %vm3291_vm1 = vmmov 0   ;;  %v870_v30 = vlaneseq }
 0x1d2   : > { %v704_v1 = vsel %vm703_vm0, %v700_v0, 0.0  ;;  %v2616_v7 = vld [vmem:[#allocation13] sm:$0xff]   ;;  %2199 = vmatprep.subr.bf16.mxu0 %v3290_v8  ;;  %2203 = vmatprep.mubr.msk.bf16.mxu0 %vm3291_vm1, %v3290_v8  ;;  %v2617_v9 = vld [vmem:[#allocation13 + $0x8] sm:$0xff]   ;;  %v2112_v14 = vld [vmem:[#allocation10] ss:$0 sm:$0xff]  ;;  %vm801_vm2 = vcmask 60416  }
 0x1d3   : > { %705 = vadd.xlane.f32.xlu0 %v704_v1  ;;  %2200 = vmatpush3.bf16.msra.mxu0 %v2616_v7  ;;  %v2113_v16 = vld [vmem:[#allocation11] ss:$0 sm:$0xff]  ;;  %v2114_v20 = vld [vmem:[#allocation14] ss:$0 sm:$0xff]  ;;  %s3292_s26 = smov 104   ;;  %s3293_s22 = smov 120  }
 0x1d4   : > { %2201 = vmatprep.subr.bf16.mxu0 %v3290_v8  ;;  %s3294_s25 = smov 72   ;;  %s3295_s9 = smov 112   ;;  %v3842_v31 = vshrl.u32 %v870_v30, 7  ;;  %v3844_v32 = vand.u32 127, %v870_v30  ;;  %v3866_v48 = vmov 0.0   ;;  %v3868_v49 = vmov 0.0  }
 0x1d5   : > { %s3296_s4 = smov 96   ;;  %s3297_s0 = smov 64   ;;  %v3870_v50 = vmov 0.0   ;;  %v3872_v51 = vmov 0.0   ;;  %v3874_v52 = vmov 0.0   ;;  %v3876_v53 = vmov 0.0  }
 0x1d6   : > { %s3298_s14 = smov 88   ;;  %v874_v33 = vsub.s32 %v3842_v31, %v3844_v32  ;;  %s3299_s23 = smov 56   ;;  %v3878_v54 = vmov 0.0   ;;  %v3880_v55 = vmov 0.0   ;;  %v3882_v56 = vmov -inf  }
 0x1d7   : > { %2202 = vmatpush3.bf16.msra.mxu0 %v2617_v9  ;;  %s3300_s6 = smov 80   ;;  %s3301_s1 = smov 48   ;;  %v3884_v57 = vmov -inf   ;;  %v3886_v58 = vmov -inf   ;;  %v3888_v59 = vmov -inf  }
 0x1d8   : > { %s3302_s28 = smov 40   ;;  %s694_s20 = scalar_lea.vmem [#allocation28], %s3790_s24 }
 0x1d9   : > { %s3890_s2 = smov 0  }
 0x260   : > { %v706_v2 = vpop.xlane.xlu0 %705 }
 0x261   : > { %v708_v3 = vmul.f32 0.03125, %v706_v2 }
 0x263   : > { %v709_v4 = vsub.f32 %v700_v0, %v708_v3 }
 0x265   : > { %v710_v5 = vmul.f32 %v709_v4, %v709_v4 }
 0x267   : > { %v711_v6 = vsel %vm703_vm0, %v710_v5, 0.0 }
 0x268   : > { %712 = vadd.xlane.f32.xlu0 %v711_v6 }
 0x2f5   : > { %v713_v10 = vpop.xlane.xlu0 %712 }
 0x2f6   : > { %v714_v11 = vmul.f32 0.03125, %v713_v10 }
 0x2f8   : > { %v715_v12 = vadd.f32 1e-05, %v714_v11 }
 0x2fa   : > { %2618 = vrsqrt.f32 %v715_v12 }
 0x304   : > { %v2619_v13 = vpop.eup %2618 }
 0x305   : > { %v717_v15 = vmul.f32 %v2619_v13, %v709_v4 }
 0x307   : > { %v724_v17 = vmul.f32 %v2112_v14, %v717_v15 }
 0x309   : > { %v731_v18 = vadd.f32 %v2113_v16, %v724_v17 }
 0x30b   : > { %v732_v19 = vpack.c.bf16 %v731_v18, %v731_v18 }
 0x30d   : > { %2204 = vmatmul.mubr.msk.bf16.vlgmr.msra.gmra.mrb[0].mxu0 %vm703_vm0, %v732_v19 }
 0x3e0   : > { %v793_v21 = vpop.f32.mrb[0].mxu0 }
 0x3e1   : > { %v794_v22 = vadd.f32 %v2114_v20, %v793_v21  ;;  %v2205_v23 = vpop.f32.mrb[1].mxu0 }
 0x3e2   : > { %v796_v24 = vpop.f32.mrb[2].mxu0 }
 0x3e3   : > { %v799_v25 = vmul.f32 0.35355338, %v794_v22  ;;  %v2206_v26 = vpop.f32.mrb[3].mxu0  ;;  %v2156_v28 = vpack.c.bf16 %v794_v22, %v794_v22 }
 0x3e5   : > { %v800_v27 = vpack.c.bf16 %v799_v25, %v799_v25 }
 0x3e7   : > { %802 = vst.msk [vmem:[#allocation2] sm:$0xf] %vm801_vm2, %v800_v27  ;;  %848 = vrot.lane.b32.xlu0 %v800_v27, %s3292_s26  ;;  %818 = vrot.lane.b32.xlu1 %v800_v27, %s3293_s22 }
 0x3eb   : > { %853 = vrot.lane.b32.xlu0 %v2156_v28, %s3294_s25  ;;  %833 = vrot.lane.b32.xlu1 %v800_v27, %s3295_s9 }
 0x3ee   : > { %v3840_v29 = vld [vmem:[#allocation2] sm:$0xf] }
 0x3ef   : > { %807 = vrot.lane.b32.xlu1 %v2156_v28, %s3296_s4 }
 0x3f3   : > { %811 = vrot.lane.b32.xlu1 %v2156_v28, %s3297_s0 }
 0x3f7   : > { %823 = vrot.lane.b32.xlu1 %v2156_v28, %s3298_s14 }
 0x3fb   : > { %828 = vrot.lane.b32.xlu1 %v2156_v28, %s3299_s23 }
 0x3ff   : > { %838 = vrot.lane.b32.xlu1 %v2156_v28, %s3300_s6 }
 0x403   : > { %843 = vrot.lane.b32.xlu1 %v2156_v28, %s3301_s1 }
 0x407   : > { %858 = vrot.lane.b32.xlu1 %v2156_v28, %s3302_s28 }
 0x459   : > { %v849_v34 = vpop.permute.xlu0 %848  ;;  %v819_v35 = vpop.permute.xlu1 %818 }
 0x45a   : > { %852 = vst.msk [vmem:[#allocation2 + $0xc] sm:$0xf] %vm801_vm2, %v849_v34  ;;  %822 = vst.msk [vmem:[#allocation2 + $0x4] sm:$0xf] %vm801_vm2, %v819_v35 }
 0x45d   : > { %v854_v36 = vpop.permute.xlu0 %853  ;;  %v834_v37 = vpop.permute.xlu1 %833 }
 0x45e   : > { %857 = vst.msk [vmem:[#allocation3 + $0xc] sm:$0xf] %vm801_vm2, %v854_v36  ;;  %837 = vst.msk [vmem:[#allocation2 + $0x8] sm:$0xf] %vm801_vm2, %v834_v37 }
 0x461   : > { %v3852_v38 = vld [vmem:[#allocation2 + $0xc] sm:$0xf]  ;;  %v3854_v39 = vld [vmem:[#allocation2 + $0x4] sm:$0xf]  ;;  %v808_v40 = vpop.permute.xlu1 %807 }
 0x462   : > { %810 = vst.msk [vmem:[#allocation3] sm:$0xf] %vm801_vm2, %v808_v40 }
 0x465   : > { %v3857_v41 = vld [vmem:[#allocation2 + $0x8] sm:$0xf]  ;;  %v812_v42 = vpop.permute.xlu1 %811 }
 0x466   : > { %814 = vst.msk [vmem:[#allocation4] sm:$0xf] %vm801_vm2, %v812_v42 }
 0x469   : > { %v824_v43 = vpop.permute.xlu1 %823 }
 0x46a   : > { %827 = vst.msk [vmem:[#allocation3 + $0x4] sm:$0xf] %vm801_vm2, %v824_v43 }
 0x46d   : > { %v829_v44 = vpop.permute.xlu1 %828 }
 0x46e   : > { %832 = vst.msk [vmem:[#allocation4 + $0x4] sm:$0xf] %vm801_vm2, %v829_v44 }
 0x471   : > { %v839_v45 = vpop.permute.xlu1 %838 }
 0x472   : > { %842 = vst.msk [vmem:[#allocation3 + $0x8] sm:$0xf] %vm801_vm2, %v839_v45 }
 0x475   : > { %v844_v46 = vpop.permute.xlu1 %843 }
 0x476   : > { %847 = vst.msk [vmem:[#allocation4 + $0x8] sm:$0xf] %vm801_vm2, %v844_v46 }
 0x479   : > { %v859_v47 = vpop.permute.xlu1 %858 }
 0x47a   : > { %862 = vst.msk [vmem:[#allocation4 + $0xc] sm:$0xf] %vm801_vm2, %v859_v47 }
 0x47b LB: >> { %v3303_v60 = vmov 0.0   ;;  %s2158_s10 = sshll.u32 %s3272_s2, 4  ;;  %vm907_vm3 = vcmask 64512   ;;  %vm3304_vm4 = vmmov 0   ;;  %s2127_s22 = sshll.u32 %s3272_s2, 3  ;;  %vm1173_vm6 = vcmask 1043456   ;;  %s3272_s2 = sphi %s3890_s2, %s879_s2   ;;  %v3268_v59 = vphi %v3888_v59, %v4279_v59   ;;  %v3264_v58 = vphi %v3886_v58, %v4278_v58   ;;  %v3260_v57 = vphi %v3884_v57, %v4277_v57   ;;  %v3256_v56 = vphi %v3882_v56, %v4276_v56   ;;  %v3252_v55 = vphi %v3880_v55, %v4275_v55   ;;  %v3248_v54 = vphi %v3878_v54, %v4274_v54   ;;  %v3244_v53 = vphi %v3876_v53, %v4273_v53   ;;  %v3240_v52 = vphi %v3874_v52, %v4272_v52   ;;  %v3236_v51 = vphi %v3872_v51, %v4271_v51   ;;  %v3232_v50 = vphi %v3870_v50, %v4270_v50   ;;  %v3228_v49 = vphi %v3868_v49, %v4269_v49   ;;  %v3224_v48 = vphi %v3866_v48, %v4268_v48  }
 0x47c   : >> { %2207 = vmatprep.subr.bf16.mxu0 %v3303_v60  ;;  %2213 = vmatprep.subr.bf16.mxu1 %v3303_v60  ;;  %s896_s26 = scalar_lea.vmem [#allocation3], %s2158_s10  ;;  %v1094_v5 = vstv %s2127_s22  ;;  %s902_s25 = scalar_lea.vmem [#allocation4], %s2158_s10 }
 0x47d   : >> { %2209 = vmatprep.mubr.msk.bf16.mxu0 %vm3304_vm4, %v3303_v60  ;;  %2215 = vmatprep.mubr.msk.bf16.mxu1 %vm3304_vm4, %v3303_v60  ;;  %v897_v61 = vld [vmem:[%s896_s26] sm:$0xf]  ;;  %v898_v62 = vld [vmem:[%s896_s26 + $0x4] sm:$0xf]  ;;  %v899_v1 = vld [vmem:[%s896_s26 + $0x8] sm:$0xf]  ;;  %vm3968_vm5 = vcmp.ge.s32.totalorder %v874_v33, %v1094_v5 }
 0x47e   : >> { %v912_v63 = vsel %vm907_vm3, %v897_v61, 0  ;;  %v958_v0 = vsel %vm907_vm3, %v898_v62, 0  ;;  %v900_v2 = vld [vmem:[%s896_s26 + $0xc] sm:$0xf]  ;;  %v1004_v3 = vsel %vm907_vm3, %v899_v1, 0  ;;  %s879_s2 = sadd.s32 1, %s3272_s2  }
 0x47f   : >> { %2208 = vmatpush3.bf16.xpose.msra.mxu0 %v912_v63  ;;  %2214 = vmatpush3.bf16.xpose.msra.mxu1 %v958_v0  ;;  %v1050_v4 = vsel %vm907_vm3, %v900_v2, 0  ;;  %p4041_p5 = scmp.ge.s32.totalorder %s879_s2, 1 }
 0x480   : >> { %2219 = vmatprep.subr.bf16.mxu0 %v3303_v60  ;;  %2225 = vmatprep.subr.bf16.mxu1 %v3303_v60  ;;  %v1368_v31 = vld [vmem:[#allocation16] sm:$0xf] (%p4041_p5)  ;;  %s1812_s0 = sshll.u32 (%p4041_p5), %s694_s20, 4  ;;  %s4281_s6 = sld [smem:[#allocation53_spill]] (%p4041_p5)  ;;  %s4133_s0 = int_to_ptr.vmem [resolvable:$true] %s1812_s0 }
 0x481   : >> { %v903_v36 = vld [vmem:[%s902_s25] sm:$0xf]  ;;  %v904_v40 = vld [vmem:[%s902_s25 + $0x4] sm:$0xf]  ;;  %v905_v43 = vld [vmem:[%s902_s25 + $0x8] sm:$0xf] }
 0x482   : >> { %v1175_v37 = vsel %vm1173_vm6, %v903_v36, 0  ;;  %v1221_v42 = vsel %vm1173_vm6, %v904_v40, 0  ;;  %v1267_v44 = vsel %vm1173_vm6, %v905_v43, 0  ;;  %v906_v45 = vld [vmem:[%s902_s25 + $0xc] sm:$0xf]  ;;  %s1798_s28 = scalar_lea.sflag (%p4041_p5), [#allocation7], %s3787_s8 }
 0x483   : >> { %v1313_v46 = vsel %vm1173_vm6, %v906_v45, 0  ;;  %s3054_s2 = scalar_lea.vmem (%p4041_p5), %s4133_s0, 128  ;;  %p4282_p2 = scmp.ne.s32.totalorder (%p4041_p5), %s4240_s16, 0 }
 0x484   : > { %p3055_p7 = scmp.ne.s32.totalorder (%p4041_p5), %s4133_s0, %s3054_s2  ;;  %s3305_s10 = smov (%p4041_p5), [#allocation28]  }
 0x485   : > { %s3058_s26 = sshll.u32 (%p4041_p5), %s3305_s10, 4  ;;  %s3059_s26 = int_to_ptr.vmem [resolvable:$false] %s3058_s26 }
 0x486   : >> { %2210 = vmatmul.mubr.msk.bf16.vlgmr.msra.gmra.mrb[0].mxu0 %vm907_vm3, %v3840_v29  ;;  %2216 = vmatmul.mubr.msk.bf16.vlgmr.msra.gmra.mrb[0].mxu1 %vm907_vm3, %v3854_v39  ;;  %p3056_p8 = pnand (%p4041_p5), %p3055_p7, %p4282_p2  ;;  %s3060_s22 = scalar_lea.vmem (%p4041_p5), %s3059_s26, 256 }
 0x487   : >> { %2220 = vmatpush3.bf16.xpose.msra.mxu0 %v1004_v3  ;;  %2226 = vmatpush3.bf16.xpose.msra.mxu1 %v1050_v4  ;;  %p3061_p1 = scmp.lt.s32.totalorder (%p4041_p5), %s4133_s0, %s3059_s26  ;;  %p3062_p6 = scmp.lt.s32.totalorder (%p4041_p5), %s3060_s22, %s3054_s2 }
 0x488   : >> { %2221 = vmatprep.mubr.msk.bf16.mxu0 %vm3304_vm4, %v3303_v60  ;;  %2227 = vmatprep.mubr.msk.bf16.mxu1 %vm3304_vm4, %v3303_v60  ;;  %p3057_p9 = pneg (%p4041_p5), %p3056_p8 }
 0x489   : >> { %2231 = vmatprep.subr.bf16.mxu0 %v3303_v60  ;;  %2237 = vmatprep.subr.bf16.mxu1 %v3303_v60  ;;  %p3063_p3 = por (%p4041_p5), %p3062_p6, %p3061_p1 }
 0x48b   : > { %p3064_p12 = pnand (%p4041_p5), %p3063_p3, %p3057_p9 }
 0x48e   : >> { %2222 = vmatmul.mubr.msk.bf16.vlgmr.msra.gmra.mrb[4].mxu0 %vm907_vm3, %v3857_v41  ;;  %2228 = vmatmul.mubr.msk.bf16.vlgmr.msra.gmra.mrb[4].mxu1 %vm907_vm3, %v3852_v38  ;;  %v1424_v41 = vsel (%p4041_p5), %vm1173_vm6, %v1368_v31, 0  ;;  %v2645_v31 = vld [vmem:[#allocation25 + $0x38] sm:$0xff] (%p4041_p5)  }
 0x48f   : >> { %2233 = vmatprep.mubr.msk.bf16.mxu0 %vm3304_vm4, %v3303_v60  ;;  %2239 = vmatprep.mubr.msk.bf16.mxu1 %vm3304_vm4, %v3303_v60 }
 0x490   : >> { %2232 = vmatpush3.bf16.msra.mxu0 %v1175_v37  ;;  %2238 = vmatpush3.bf16.msra.mxu1 %v1221_v42 }
 0x491   : >> { %2243 = vmatprep.subr.bf16.mxu0 %v3303_v60  ;;  %2249 = vmatprep.subr.bf16.mxu1 %v3303_v60 }
 0x559   : >> { %v948_v7 = vpop.f32.mrb[0].mxu0  ;;  %v994_v9 = vpop.f32.mrb[0].mxu1 }
 0x55a   : >> { %v1098_v10 = vsel %vm3968_vm5, %v948_v7, -inf  ;;  %v2211_v11 = vpop.f32.mrb[1].mxu0  ;;  %v1099_v12 = vsel %vm3968_vm5, %v994_v9, -inf  ;;  %v2217_v13 = vpop.f32.mrb[1].mxu1 }
 0x55b   : >> { %v951_v14 = vpop.f32.mrb[2].mxu0  ;;  %v1102_v15 = vsel %vm907_vm3, %v1098_v10, -inf  ;;  %v997_v16 = vpop.f32.mrb[2].mxu1  ;;  %v1105_v19 = vsel %vm907_vm3, %v1099_v12, -inf }
 0x55c   : >> { %1103 = vmax.xlane.f32.xlu0 %v1102_v15  ;;  %v2212_v17 = vpop.f32.mrb[3].mxu0  ;;  %v2218_v18 = vpop.f32.mrb[3].mxu1 }
 0x560   : >> { %1106 = vmax.xlane.f32.xlu0 %v1105_v19 }
 0x561   : >> { %v1040_v20 = vpop.f32.mrb[4].mxu0  ;;  %v1086_v21 = vpop.f32.mrb[4].mxu1 }
 0x562   : >> { %v1100_v22 = vsel %vm3968_vm5, %v1040_v20, -inf  ;;  %v2223_v23 = vpop.f32.mrb[5].mxu0  ;;  %v1101_v24 = vsel %vm3968_vm5, %v1086_v21, -inf  ;;  %v2229_v25 = vpop.f32.mrb[5].mxu1 }
 0x563   : >> { %v1043_v26 = vpop.f32.mrb[6].mxu0  ;;  %v1108_v27 = vsel %vm907_vm3, %v1100_v22, -inf  ;;  %v1089_v28 = vpop.f32.mrb[6].mxu1  ;;  %v1111_v35 = vsel %vm907_vm3, %v1101_v24, -inf }
 0x564   : >> { %1109 = vmax.xlane.f32.xlu1 %v1108_v27  ;;  %v2224_v30 = vpop.f32.mrb[7].mxu0  ;;  %v2230_v34 = vpop.f32.mrb[7].mxu1 }
 0x568   : >> { %1112 = vmax.xlane.f32.xlu1 %v1111_v35 }
 0x5e9   : >> { %v1104_v47 = vpop.xlane.xlu0 %1103 }
 0x5ea   : >> { %v3993_v61 = vmax.f32 %v3268_v59, %v1104_v47  }
 0x5ec   : >> { %v1118_v62 = vsub.f32 %v3268_v59, %v3993_v61  ;;  %v1130_v63 = vsub.f32 %v1098_v10, %v3993_v61 }
 0x5ed   : >> { %v1107_v0 = vpop.xlane.xlu0 %1106 }
 0x5ee   : >> { %v1134_v1 = vmul.f32 1.442695, %v1130_v63  ;;  %v3999_v2 = vmax.f32 %v3264_v58, %v1107_v0   ;;  %v1122_v25 = vmul.f32 1.442695, %v1118_v62 }
 0x5f0   : >> { %v1119_v3 = vsub.f32 %v3264_v58, %v3999_v2  ;;  %v1131_v4 = vsub.f32 %v1099_v12, %v3999_v2  ;;  %2620 = vpow2.f32 %v1134_v1 }
 0x5f1   : >> { %v1110_v5 = vpop.xlane.xlu1 %1109 }
 0x5f2   : >> { %v1136_v6 = vmul.f32 1.442695, %v1131_v4  ;;  %v4005_v7 = vmax.f32 %v3260_v57, %v1110_v5   ;;  %v1124_v26 = vmul.f32 1.442695, %v1119_v3 }
 0x5f4   : >> { %v1120_v59 = vsub.f32 %v3260_v57, %v4005_v7  ;;  %v1132_v9 = vsub.f32 %v1100_v22, %v4005_v7  ;;  %2622 = vpow2.f32 %v1136_v6 }
 0x5f5   : >> { %v1113_v10 = vpop.xlane.xlu1 %1112 }
 0x5f6   : >> { %v1138_v11 = vmul.f32 1.442695, %v1132_v9  ;;  %v4011_v13 = vmax.f32 %v3256_v56, %v1113_v10   ;;  %v1126_v27 = vmul.f32 1.442695, %v1120_v59 }
 0x5f8   : >> { %v1121_v58 = vsub.f32 %v3256_v56, %v4011_v13  ;;  %v1133_v12 = vsub.f32 %v1101_v24, %v4011_v13  ;;  %2624 = vpow2.f32 %v1138_v11 }
 0x5fa   : >> { %v1140_v14 = vmul.f32 1.442695, %v1133_v12  ;;  %v2621_v15 = vpop.eup %2620 }
 0x5fb   : >> { %v1146_v16 = vsel %vm907_vm3, %v2621_v15, 0.0  ;;  %v1166_v17 = vpack.c.bf16 %v2621_v15, %v2621_v15 }
 0x5fc   : >> { %2626 = vpow2.f32 %v1140_v14  ;;  %1147 = vadd.xlane.f32.xlu0 %v1146_v16 }
 0x5fd   : >> { %2234 = vmatmul.mubr.msk.bf16.vlgmr.msra.gmra.mrb[8].mxu0 %vm907_vm3, %v1166_v17  ;;  %2628 = vpow2.f32 %v1122_v25 }
 0x5fe   : >> { %v2623_v57 = vpop.eup %2622  ;;  %2244 = vmatpush3.bf16.msra.mxu0 %v1267_v44  ;;  %2245 = vmatprep.mubr.msk.bf16.mxu0 %vm3304_vm4, %v3303_v60  ;;  %2630 = vpow2.f32 %v1124_v26 }
 0x5ff   : >> { %v1149_v18 = vsel %vm907_vm3, %v2623_v57, 0.0  ;;  %v1167_v56 = vpack.c.bf16 %v2623_v57, %v2623_v57  ;;  %2632 = vpow2.f32 %v1126_v27  ;;  %2255 = vmatprep.subr.bf16.mxu0 (%p4041_p5), %v3290_v8 }
 0x600   : >> { %1150 = vadd.xlane.f32.xlu1 %v1149_v18 }
 0x601   : >> { %2240 = vmatmul.mubr.msk.bf16.vlgmr.msra.gmra.mrb[8].mxu1 %vm907_vm3, %v1167_v56 }
 0x602   : >> { %v2625_v19 = vpop.eup %2624  ;;  %2250 = vmatpush3.bf16.msra.mxu1 %v1313_v46  ;;  %2251 = vmatprep.mubr.msk.bf16.mxu1 %vm3304_vm4, %v3303_v60  ;;  %v1128_v60 = vmul.f32 1.442695, %v1121_v58 }
 0x603   : >> { %v1152_v20 = vsel %vm907_vm3, %v2625_v19, 0.0  ;;  %v1168_v21 = vpack.c.bf16 %v2625_v19, %v2625_v19  ;;  %v1371_v19 = vld [vmem:[#allocation16 + $0x4] sm:$0xf] (%p4041_p5)  ;;  %2273 = vmatprep.subr.bf16.mxu1 (%p4041_p5), %v3290_v8 }
 0x604   : >> { %1153 = vadd.xlane.f32.xlu0 %v1152_v20  ;;  %2634 = vpow2.f32 %v1128_v60  ;;  %v1468_v20 = vld [vmem:[#allocation16 + $0x8] sm:$0xf] (%p4041_p5) }
 0x605   : >> { %2246 = vmatmul.mubr.msk.bf16.vlgmr.msra.gmra.mrb[12].mxu0 %vm907_vm3, %v1168_v21 }
 0x606   : >> { %v2627_v22 = vpop.eup %2626  ;;  %2257 = vmatprep.mubr.msk.bf16.mxu0 (%p4041_p5), %vm3291_vm1, %v3290_v8 }
 0x607   : >> { %v1155_v23 = vsel %vm907_vm3, %v2627_v22, 0.0  ;;  %v1169_v24 = vpack.c.bf16 %v2627_v22, %v2627_v22  ;;  %v2629_v28 = vpop.eup %2628 }
 0x608   : >> { %1156 = vadd.xlane.f32.xlu1 %v1155_v23  ;;  %v1142_v30 = vmul.f32 %v3252_v55, %v2629_v28  ;;  %v2631_v34 = vpop.eup %2630  ;;  %v1162_v1 = vmul.f32 %v3236_v51, %v2629_v28  ;;  %v1473_v23 = vsel (%p4041_p5), %vm1173_vm6, %v1468_v20, 0 }
 0x609   : >> { %2252 = vmatmul.mubr.msk.bf16.vlgmr.msra.gmra.mrb[12].mxu1 %vm907_vm3, %v1169_v24  ;;  %v1143_v37 = vmul.f32 %v3248_v54, %v2631_v34  ;;  %v2633_v40 = vpop.eup %2632  ;;  %v1163_v6 = vmul.f32 %v3232_v50, %v2631_v34 }
 0x60a   : >> { %v1144_v44 = vmul.f32 %v3244_v53, %v2633_v40  ;;  %v1164_v58 = vmul.f32 %v3228_v49, %v2633_v40  ;;  %2275 = vmatprep.mubr.msk.bf16.mxu1 (%p4041_p5), %vm3291_vm1, %v3290_v8 }
 0x60e   : >> { %v2635_v45 = vpop.eup %2634 }
 0x60f   : >> { %v1145_v62 = vmul.f32 %v3240_v52, %v2635_v45 }
 0x689   : >> { %v1148_v35 = vpop.xlane.xlu0 %1147 }
 0x68a   : >> { %v1158_v36 = vadd.f32 %v1148_v35, %v1142_v30  }
 0x68d   : >> { %v1151_v42 = vpop.xlane.xlu1 %1150 }
 0x68e   : >> { %v1159_v43 = vadd.f32 %v1151_v42, %v1143_v37  }
 0x690   : > { %2646 = vrcp.f32 (%p4041_p5), %v1159_v43 }
 0x691   : >> { %v1154_v46 = vpop.xlane.xlu0 %1153  ;;  %2648 = vrcp.f32 (%p4041_p5), %v1158_v36 }
 0x692   : >> { %v1160_v47 = vadd.f32 %v1154_v46, %v1144_v44  }
 0x695   : >> { %v1157_v63 = vpop.xlane.xlu1 %1156 }
 0x696   : >> { %v1161_v0 = vadd.f32 %v1157_v63, %v1145_v62   ;;  %v2136_v62 = vld [vmem:[#allocation17] ss:$0 sm:$0xff] (%p4041_p5) }
 0x698   : > { %2650 = vrcp.f32 (%p4041_p5), %v1161_v0 }
 0x699   : > { %2652 = vrcp.f32 (%p4041_p5), %v1160_v47 }
 0x69a   : > { %v2647_v29 = vpop.eup (%p4041_p5), %2646 }
 0x69b   : > { %v2649_v32 = vpop.eup (%p4041_p5), %2648 }
 0x6a2   : > { %v2651_v38 = vpop.eup (%p4041_p5), %2650 }
 0x6a3   : > { %v2653_v22 = vpop.eup (%p4041_p5), %2652 }
 0x6d0   : >> { %v1211_v55 = vpop.f32.mrb[8].mxu0 }
 0x6d1   : >> { %v4033_v51 = vadd.f32 %v1211_v55, %v1162_v1   ;;  %v2235_v4 = vpop.f32.mrb[9].mxu0  ;;  %v4275_v55 = vmov %v1158_v36 }
 0x6d2   : >> { %v1214_v5 = vpop.f32.mrb[10].mxu0  ;;  %v1574_v55 = vld [vmem:[%s597_s19] sm:$0xff] (%p4041_p5)  ;;  %s4280_s19 = sld [smem:[#allocation39_spill]] (%p4041_p5) }
 0x6d3   : >> { %v4265_v3 = vmov %v4033_v51  ;;  %v2236_v54 = vpop.f32.mrb[11].mxu0  ;;  %v1165_v51 = vmul.f32 %v3224_v48, %v2635_v45 }
 0x6d4   : >> { %v1257_v59 = vpop.f32.mrb[8].mxu1  ;;  %v4274_v54 = vmov %v1159_v43 }
 0x6d5   : >> { %v1356_v9 = vadd.f32 %v1257_v59, %v1163_v6   ;;  %v2241_v53 = vpop.f32.mrb[9].mxu1  ;;  %v4279_v59 = vmov %v3993_v61 }
 0x6d6   : >> { %v1260_v10 = vpop.f32.mrb[10].mxu1  ;;  %v4273_v53 = vmov %v1160_v47 }
 0x6d7   : >> { %v2242_v11 = vpop.f32.mrb[11].mxu1  ;;  %v1364_v33 = vmul.f32 (%p4041_p5), %v2647_v29, %v1356_v9  ;;  %v2636_v10 = vld [vmem:[#allocation22] sm:$0xff] (%p4041_p5)  }
 0x6d8   : >> { %v1303_v52 = vpop.f32.mrb[12].mxu0  ;;  %v2637_v11 = vld [vmem:[#allocation22 + $0x8] sm:$0xff] (%p4041_p5)   ;;  %s2153_s4 = sshll.u32 (%p4041_p5), %s4280_s19, 7 }
 0x6d9   : >> { %v4037_v49 = vadd.f32 %v1303_v52, %v1164_v58   ;;  %v2247_v14 = vpop.f32.mrb[13].mxu0  ;;  %v4272_v52 = vmov %v1161_v0  ;;  %v4278_v58 = vmov %v3999_v2  ;;  %v1518_v2 = vld [vmem:[#allocation16 + $0xc] sm:$0xf] (%p4041_p5)  ;;  %v1369_v39 = vpack.c.bf16 (%p4041_p5), %v1364_v33, %v1364_v33  ;;  %v2644_v29 = vld [vmem:[#allocation25 + $0x30] sm:$0xff] (%p4041_p5)   ;;  %s4131_s1 = scalar_lea.hbm (%p4041_p5), %s4281_s6, %s2153_s4 }
 0x6da   : >> { %v1306_v15 = vpop.f32.mrb[14].mxu0  ;;  %881 = sbr.rel (!%p4041_p5) target bundleno = 1147 (0x47b), region = 208  ;;  %v1523_v61 = vsel (%p4041_p5), %vm1173_vm6, %v1518_v2, 0  ;;  %v2638_v58 = vld [vmem:[#allocation25] sm:$0xff] (%p4041_p5)  }
 0x6db   : >> { %v4266_v12 = vmov %v4037_v49  ;;  %v2248_v16 = vpop.f32.mrb[15].mxu0  ;;  %2274 = vmatpush3.bf16.msra.mxu1 (%p4041_p5), %v1523_v61  ;;  %v2642_v2 = vld [vmem:[#allocation25 + $0x20] sm:$0xff] (%p4041_p5)   ;;  %v2643_v61 = vld [vmem:[#allocation25 + $0x28] sm:$0xff] (%p4041_p5)  }
 0x6dc   : >> { %v1349_v17 = vpop.f32.mrb[12].mxu1  ;;  %v4269_v49 = vmov %v4266_v12  ;;  %2287 = vmatprep.subr.bf16.mxu1 (%p4041_p5), %v3290_v8  ;;  %v1365_v24 = vmul.f32 (%p4041_p5), %v2653_v22, %v4266_v12  ;;  %v2137_v16 = vld [vmem:[#allocation19] ss:$0 sm:$0xff] (%p4041_p5) }
 0x6dd   : >> { %v1358_v18 = vadd.f32 %v1349_v17, %v1165_v51   ;;  %v2253_v57 = vpop.f32.mrb[13].mxu1  ;;  %v4271_v51 = vmov %v4265_v3  ;;  %v1363_v49 = vmul.f32 (%p4041_p5), %v2649_v32, %v4265_v3  ;;  %v2138_v17 = vld [vmem:[#allocation20] ss:$0 sm:$0xff] (%p4041_p5)  ;;  %v2139_v32 = vld [vmem:[#allocation23] ss:$0 sm:$0xff] (%p4041_p5) }
 0x6de   : >> { %v1352_v56 = vpop.f32.mrb[14].mxu1  ;;  %v4277_v57 = vmov %v4005_v7  ;;  %v1466_v25 = vpack.c.bf16 (%p4041_p5), %v1365_v24, %v1365_v24 }
 0x6df   : >> { %v2254_v50 = vpop.f32.mrb[15].mxu1  ;;  %v4268_v48 = vmov %v1358_v18  ;;  %v4276_v56 = vmov %v4011_v13  ;;  %v1378_v13 = vsel (%p4041_p5), %vm1173_vm6, %v1371_v19, 0  ;;  %v1367_v21 = vpack.c.bf16 (%p4041_p5), %v1363_v49, %v1363_v49  ;;  %v2640_v19 = vld [vmem:[#allocation25 + $0x10] sm:$0xff] (%p4041_p5)  }
 0x6e0   : >> { %v4270_v50 = vmov %v1356_v9  ;;  %2256 = vmatpush3.bf16.msra.mxu0 (%p4041_p5), %v1378_v13  ;;  %v1366_v48 = vmul.f32 (%p4041_p5), %v2651_v38, %v1358_v18  ;;  %v2641_v13 = vld [vmem:[#allocation25 + $0x18] sm:$0xff] (%p4041_p5)  }
 0x6e1   : > { %2261 = vmatprep.subr.bf16.mxu0 %v3290_v8  ;;  %v2639_v50 = vld [vmem:[#allocation25 + $0x8] sm:$0xff]  }
 0x6e2   : > { %v1516_v7 = vpack.c.bf16 %v1366_v48, %v1366_v48 }
 0x6e3   : > { %2258 = vmatmul.mubr.msk.bf16.vlgmr.msra.gmra.mrb[0].mxu0 %vm907_vm3, %v1369_v39 }
 0x6e4   : > { %2262 = vmatpush3.bf16.msra.mxu0 %v1424_v41  ;;  %2263 = vmatprep.mubr.msk.bf16.mxu0 %vm3291_vm1, %v3290_v8 }
 0x6e5   : > { %2267 = vmatprep.subr.bf16.mxu0 %v3290_v8  ;;  %2276 = vmatmul.mubr.msk.bf16.vlgmr.msra.gmra.mrb[0].mxu1 %vm907_vm3, %v1516_v7 }
 0x6e6   : > { %2303 = vmatprep.mubr.msk.bf16.mxu1 %vm3291_vm1, %v3290_v8  ;;  %2288 = vmatpush3.bf16.msra.mxu1 %v2638_v58 }
 0x6e7   : > { %2289 = vmatprep.subr.bf16.mxu1 %v3290_v8 }
 0x6ea   : > { %2290 = vmatpush3.bf16.msra.mxu1 %v2639_v50 }
 0x6eb   : > { %2264 = vmatmul.mubr.msk.bf16.vlgmr.msra.gmra.mrb[4].mxu0 %vm907_vm3, %v1367_v21  ;;  %2291 = vmatprep.subr.bf16.mxu1 %v3290_v8 }
 0x6ec   : > { %2268 = vmatpush3.bf16.msra.mxu0 %v1473_v23  ;;  %2269 = vmatprep.mubr.msk.bf16.mxu0 %vm3291_vm1, %v3290_v8 }
 0x6ed   : > { %2279 = vmatprep.subr.bf16.mxu0 %v3290_v8 }
 0x6ee   : > { %2292 = vmatpush3.bf16.msra.mxu1 %v2640_v19 }
 0x6ef   : > { %2293 = vmatprep.subr.bf16.mxu1 %v3290_v8 }
 0x6f2   : > { %2294 = vmatpush3.bf16.msra.mxu1 %v2641_v13 }
 0x6f3   : > { %2270 = vmatmul.mubr.msk.bf16.vlgmr.msra.gmra.mrb[8].mxu0 %vm907_vm3, %v1466_v25  ;;  %2295 = vmatprep.subr.bf16.mxu1 %v3290_v8 }
 0x6f4   : > { %2283 = vmatprep.mubr.msk.bf16.mxu0 %vm3291_vm1, %v3290_v8  ;;  %2280 = vmatpush3.bf16.msra.mxu0 %v2636_v10 }
 0x6f5   : > { %2281 = vmatprep.subr.bf16.mxu0 %v3290_v8 }
 0x6f6   : > { %2296 = vmatpush3.bf16.msra.mxu1 %v2642_v2 }
 0x6f7   : > { %2297 = vmatprep.subr.bf16.mxu1 %v3290_v8 }
 0x6f8   : > { %2282 = vmatpush3.bf16.msra.mxu0 %v2637_v11 }
 0x6fa   : > { %2298 = vmatpush3.bf16.msra.mxu1 %v2643_v61 }
 0x6fb   : > { %2299 = vmatprep.subr.bf16.mxu1 %v3290_v8 }
 0x6fe   : > { %2300 = vmatpush3.bf16.msra.mxu1 %v2644_v29 }
 0x6ff   : > { %2301 = vmatprep.subr.bf16.mxu1 %v3290_v8 }
 0x702   : > { %2302 = vmatpush3.bf16.msra.mxu1 %v2645_v31 }
 0x7b6   : > { %v1414_v26 = vpop.f32.mrb[0].mxu0 }
 0x7b7   : > { %v2259_v27 = vpop.f32.mrb[1].mxu0 }
 0x7b8   : > { %v1417_v60 = vpop.f32.mrb[2].mxu0  ;;  %v1559_v28 = vpop.f32.mrb[0].mxu1  ;;  %v2143_v27 = vld [vmem:[#allocation26] ss:$0 sm:$0xff] }
 0x7b9   : > { %v2260_v30 = vpop.f32.mrb[3].mxu0  ;;  %v2277_v34 = vpop.f32.mrb[1].mxu1 }
 0x7ba   : > { %v1562_v35 = vpop.f32.mrb[2].mxu1 }
 0x7bb   : > { %v2278_v36 = vpop.f32.mrb[3].mxu1 }
 0x7be   : > { %v1460_v37 = vpop.f32.mrb[4].mxu0 }
 0x7bf   : > { %v1461_v40 = vadd.f32 %v1460_v37, %v1414_v26  ;;  %v2265_v42 = vpop.f32.mrb[5].mxu0 }
 0x7c0   : > { %v1463_v43 = vpop.f32.mrb[6].mxu0 }
 0x7c1   : > { %v2266_v44 = vpop.f32.mrb[7].mxu0 }
 0x7c6   : > { %v1509_v45 = vpop.f32.mrb[8].mxu0 }
 0x7c7   : > { %v1515_v46 = vadd.f32 %v1509_v45, %v1461_v40  ;;  %v2271_v47 = vpop.f32.mrb[9].mxu0 }
 0x7c8   : > { %v1512_v63 = vpop.f32.mrb[10].mxu0 }
 0x7c9   : > { %v1565_v0 = vadd.f32 %v1559_v28, %v1515_v46  ;;  %v2272_v1 = vpop.f32.mrb[11].mxu0 }
 0x7cb   : > { %v1573_v3 = vadd.f32 %v2136_v62, %v1565_v0 }
 0x7cd   : > { %v4109_v4 = vadd.f32 %v1574_v55, %v1573_v3 }
 0x7cf   : > { %v1579_v5 = vsel %vm703_vm0, %v4109_v4, 0.0 }
 0x7d0   : > { %1580 = vadd.xlane.f32.xlu0 %v1579_v5 }
 0x85d   : > { %v1581_v54 = vpop.xlane.xlu0 %1580 }
 0x85e   : > { %v1583_v6 = vmul.f32 0.03125, %v1581_v54 }
 0x860   : > { %v1584_v59 = vsub.f32 %v4109_v4, %v1583_v6 }
 0x862   : > { %v1585_v9 = vmul.f32 %v1584_v59, %v1584_v59 }
 0x864   : > { %v1586_v53 = vsel %vm703_vm0, %v1585_v9, 0.0 }
 0x865   : > { %1587 = vadd.xlane.f32.xlu0 %v1586_v53 }
 0x8f2   : > { %v1588_v52 = vpop.xlane.xlu0 %1587 }
 0x8f3   : > { %v1589_v12 = vmul.f32 0.03125, %v1588_v52 }
 0x8f5   : > { %v1590_v14 = vadd.f32 1e-05, %v1589_v12 }
 0x8f7   : > { %2654 = vrsqrt.f32 %v1590_v14 }
 0x901   : > { %v2655_v15 = vpop.eup %2654 }
 0x902   : > { %v1592_v51 = vmul.f32 %v2655_v15, %v1584_v59 }
 0x904   : > { %v1599_v18 = vmul.f32 %v2137_v16, %v1592_v51 }
 0x906   : > { %v1606_v57 = vadd.f32 %v2138_v17, %v1599_v18 }
 0x908   : > { %v1607_v56 = vpack.c.bf16 %v1606_v57, %v1606_v57 }
 0x90a   : > { %2284 = vmatmul.mubr.msk.bf16.vlgmr.msra.gmra.mrb[12].mxu0 %vm703_vm0, %v1607_v56 }
 0x9dd   : > { %v1668_v33 = vpop.f32.mrb[12].mxu0 }
 0x9de   : > { %v1669_v38 = vadd.f32 %v2139_v32, %v1668_v33  ;;  %v2285_v39 = vpop.f32.mrb[13].mxu0 }
 0x9df   : > { %v1671_v41 = vpop.f32.mrb[14].mxu0 }
 0x9e0   : > { %v1675_v48 = vmul.f32 0.044715, %v1669_v38  ;;  %v2286_v49 = vpop.f32.mrb[15].mxu0  ;;  %v1674_v24 = vmul.f32 0.5, %v1669_v38 }
 0x9e2   : > { %v1676_v7 = vmul.f32 %v1675_v48, %v1669_v38 }
 0x9e4   : > { %v1677_v20 = vmul.f32 %v1676_v7, %v1669_v38 }
 0x9e6   : > { %v1678_v21 = vadd.f32 %v1677_v20, %v1669_v38 }
 0x9e8   : > { %v1679_v22 = vmul.f32 0.7978846, %v1678_v21 }
 0x9ea   : > { %2656 = vtanh.f32 %v1679_v22 }
 0x9f4   : > { %v2657_v23 = vpop.eup %2656 }
 0x9f5   : > { %v1681_v25 = vadd.f32 1.0, %v2657_v23 }
 0x9f7   : > { %v1682_v8 = vmul.f32 %v1681_v25, %v1674_v24 }
 0x9f9   : > { %v1683_v26 = vpack.c.bf16 %v1682_v8, %v1682_v8 }
 0x9fb   : > { %2304 = vmatmul.mubr.bf16.vlgmr.msra.gmra.mrb[4].mxu1 %v1683_v26 }
 0xace   : > { %v1789_v60 = vpop.f32.mrb[4].mxu1 }
 0xacf   : > { %v1790_v28 = vadd.f32 %v2143_v27, %v1789_v60  ;;  %v2305_v30 = vpop.f32.mrb[5].mxu1 }
 0xad0   : > { %v1792_v34 = vpop.f32.mrb[6].mxu1 }
 0xad1   : > { %v1795_v35 = vadd.f32 %v1790_v28, %v4109_v4  ;;  %v2306_v36 = vpop.f32.mrb[7].mxu1 }
 0xad3   : > { %1796 = vst.msk [vmem:[%s694_s20] sm:$0xff] %vm703_vm0, %v1795_v35 }
 0xad4   : > { %3067 = shalt.err (!%p3064_p12)
}
 0xad5   : > { %s3068_s8 = scalar_lea.hbm %s4131_s1, 128  ;;  %s3072_s25 = scalar_lea.hbm %s4281_s6, 256 }
 0xad6   : > { %p3069_p0 = scmp.ne.s32.totalorder %s4131_s1, %s3068_s8  ;;  %p3073_p4 = scmp.lt.u32.totalorder %s4131_s1, %s4281_s6 }
 0xad7   : > { %p3074_p11 = scmp.lt.u32.totalorder %s3072_s25, %s3068_s8  ;;  %p3076_p7 = scmp.lt.u32.totalorder %s3068_s8, %s4131_s1 }
 0xad8   : > { %p3070_p10 = pnand %p3069_p0, %p4282_p2 }
 0xad9   : > { %p3075_p5 = por %p3074_p11, %p3073_p4 }
 0xada   : > { %p3071_p13 = pneg %p3070_p10 }
 0xadb   : > { %p3077_p8 = por %p3076_p7, %p3075_p5 }
 0xadd   : > { %p3078_p9 = pnand %p3077_p8, %p3071_p13 }
 0xadf   : > { %3081 = shalt.err (!%p3078_p9)
}
 0xae0   : > { %2359 = dma.vmem_to_hbm [thread:$0]  (%p4282_p2), %s4133_s0, 128, %s4131_s1, %s1798_s28  }
 0xae1 PF: > { %s1824_s4 = sand.u32 1, %s3200_s29   ;;  %p4283_p1 = scmp.ne.s32.totalorder %s4241_s7, 0 }
 0xae2   : > { %p4284_p6 = scmp.ge.s32.totalorder %s3220_s18, 2  ;;  %s1825_s14 = scalar_lea.sflag [#allocation7], %s1824_s4 }
 0xae4   : > { %p2406_p3 = pnand %p4284_p6, %p4283_p1 }
 0xae6   : > { %3195 = dma.done.wait (!%p2406_p3), %s1825_s14, 128  }
 0xae7   : > { %3197 = vsyncadd (!%p2406_p3), %s1825_s14, 4294967168  ;;  %s39_s18 = sadd.s32 1, %s3220_s18   ;;  %s4285_s29 = smov %s3204_s30 }
 0xae8   : > { %p36_p12 = scmp.ge.s32.totalorder %s39_s18, 4   ;;  %s4286_s30 = smov %s3208_s15 }
 0xae9   : > { %s4287_s15 = smov %s3708_s3  ;;  %s4288_s16 = smov %s3216_s17 }
 0xaea   : > { %s4289_s17 = smov %s4291_s5  ;;  %38 = sbr.rel (!%p36_p12) target bundleno = 27 (0x1b), region = 219 }
 0xaf1   :  { %1830 = vsyncpa [#allocation6], 1 }
 0xaf2   :  { %1832 = vsyncpa [#allocation6 + $0x1], 1 }
 0xaf3   :  { %1833 = vsyncpa [#allocation9], 1 }
 0xaf4   :  { %1835 = vsyncpa [#allocation9 + $0x1], 1 }
 0xaf5   :  { %1836 = vsyncpa [#allocation12], 1 }
 0xaf6   :  { %1837 = vsyncpa [#allocation15], 1 }
 0xaf7   :  { %1838 = vsyncpa [#allocation18], 1 }
 0xaf8   :  { %1839 = vsyncpa [#allocation21], 1 }
 0xaf9   :  { %1840 = vsyncpa [#allocation24], 1 }
 0xafa   :  { %1841 = vsyncpa [#allocation27], 1 }
 0xafb   :  { %1842 = vsyncpa [#allocation7], 1 }
 0xafc   :  { %1844 = vsyncpa [#allocation7 + $0x1], 1 }

</bundles_post_ra>
